<compile_context>
chip_gen: v5e
topology: v5e:2x2
jax: 0.10.0
libtpu: 0.0.40
codegen_flags: <defaults>
</compile_context>

<pallas_src>
import jax
import jax.numpy as jnp
from jax.experimental import pallas as pl
from jax.experimental.pallas import tpu as pltpu

# TODO(synk): SentenceTransformer('all-distilroberta-v1').encode() has no
# Pallas equivalent; its output is modeled as the kernel's input embeddings.


def _round_up(x: int, m: int) -> int:
    return ((x + m - 1) // m) * m


def _embedder_kernel(x_ref, w_ref, b_ref, o_ref):
    # x: (tm, D_in) f32, w: (D_in, D_out) bf16 (pre-transposed), b: (1, D_out) f32
    x = x_ref[...].astype(jnp.bfloat16)

    # Linear in MXU-native (M,K)x(K,N) layout; bf16 inputs, f32 accumulation.
    y = jnp.dot(x, w_ref[...], preferred_element_type=jnp.float32)
    y = y + b_ref[...]            # bias add in f32 (VPU)
    y = jnp.maximum(y, 0.0)       # ReLU in f32 (VPU)

    # L2 normalize along dim=1; clamp on squared norm (1e-12^2) == F.normalize.
    ss = jnp.sum(y * y, axis=1, keepdims=True)
    inv = jax.lax.rsqrt(jnp.maximum(ss, 1e-24))   # single EUP rsqrt
    o_ref[...] = (y * inv).astype(o_ref.dtype)


def prepare_params(weight, bias):
    """One-time (model-init) param prep.

    weight: (D_out, D_in) torch-layout f32  ->  (D_in, D_out) bf16 (transposed
    once in HBM; amortized to zero over all forward calls).
    bias:   (D_out,) f32                    ->  (1, D_out) f32.
    """
    w_t_bf16 = weight.T.astype(jnp.bfloat16)       # (D_in, D_out)
    b2d = bias.reshape(1, -1).astype(jnp.float32)  # (1, D_out)
    return w_t_bf16, b2d


def _choose_batch_tile(B: int, block_m: int) -> int:
    """Balanced batch tile: multiple of 16 rows, <= block_m, >=2 tiles when
    the batch is big enough so v7x's two TensorCores both get work."""
    num_tiles = pl.cdiv(B, block_m)
    if num_tiles == 1 and B > 16:
        num_tiles = 2                      # let megacore sharding kick in
    tm = _round_up(pl.cdiv(B, num_tiles), 16)
    return min(tm, _round_up(block_m, 16))


def sentence_embedder_forward(seq_embeddings, w_t_bf16, b2d, *, block_m=1024,
                              out_dtype=jnp.float32):
    """seq_embeddings: (B, D_in) f32; w_t_bf16: (D_in, D_out) bf16; b2d: (1, D_out) f32."""
    B, D_in = seq_embeddings.shape
    D_out = w_t_bf16.shape[1]

    tm = _choose_batch_tile(B, block_m)
    Bp = _round_up(B, tm)
    x = seq_embeddings
    if Bp != B:
        x = jnp.pad(x, ((0, Bp - B), (0, 0)))
    grid = (Bp // tm,)

    # Actual VMEM footprint: double-buffered x/out tiles + resident weight/bias,
    # plus a small margin for internal scratch.
    x_tile_bytes = tm * D_in * x.dtype.itemsize
    o_tile_bytes = tm * D_out * jnp.dtype(out_dtype).itemsize
    resident_bytes = w_t_bf16.size * 2 + b2d.size * 4
    vmem_limit = int(2 * (x_tile_bytes + o_tile_bytes) + 2 * resident_bytes + (4 << 20))

    # Advisory cost for XLA's scheduler (mem-bound epilogue of the encoder).
    flops = 2 * Bp * D_in * D_out
    bytes_accessed = (Bp * D_in * x.dtype.itemsize + resident_bytes
                      + Bp * D_out * jnp.dtype(out_dtype).itemsize)

    out = pl.pallas_call(
        _embedder_kernel,
        out_shape=jax.ShapeDtypeStruct((Bp, D_out), out_dtype),
        grid=grid,
        in_specs=[
            pl.BlockSpec((tm, D_in), lambda i: (i, 0)),      # x tile, pipelined
            pl.BlockSpec((D_in, D_out), lambda i: (0, 0)),   # weight, VMEM-resident
            pl.BlockSpec((1, D_out), lambda i: (0, 0)),      # bias, VMEM-resident
        ],
        out_specs=pl.BlockSpec((tm, D_out), lambda i: (i, 0)),
        compiler_params=pltpu.CompilerParams(
            dimension_semantics=("parallel",),
            vmem_limit_bytes=vmem_limit,
        ),
        cost_estimate=pl.CostEstimate(
            flops=flops, bytes_accessed=bytes_accessed, transcendentals=0),
    )(x, w_t_bf16, b2d)

    return out[:B] if Bp != B else out


def reference_forward(x, weight, bias):
    """Pure-JAX f32 reference of the torch forward (post-encode)."""
    y = x @ weight.T + bias
    y = jnp.maximum(y, 0.0)
    norm = jnp.maximum(jnp.sqrt(jnp.sum(y * y, axis=1, keepdims=True)), 1e-12)
    return y / norm


if __name__ == "__main__":
    # batch of 8 "sentences"; sentence_dim = 768 (all-distilroberta-v1).
    B, D = 8, 768
    key = jax.random.PRNGKey(0)
    k_x, k_w, k_b = jax.random.split(key, 3)

    # "Encoded" sentence embeddings (stand-in for transformer.encode output).
    seq_embeddings = jax.random.normal(k_x, (B, D), dtype=jnp.float32)

    # Deterministic nn.Linear(D, D) parameters (torch layout: weight (out, in)).
    bound = 1.0 / (D ** 0.5)
    weight = jax.random.uniform(k_w, (D, D), jnp.float32, -bound, bound)
    bias = jax.random.uniform(k_b, (D,), jnp.float32, -bound, bound)

    # One-time param prep (transpose + bf16 cast), then run the kernel.
    w_t_bf16, b2d = prepare_params(weight, bias)
    out = sentence_embedder_forward(seq_embeddings, w_t_bf16, b2d)
    out = jax.block_until_ready(out)

    ref = reference_forward(seq_embeddings, weight, bias)
    assert out.shape == (B, D)
    # bf16 x bf16 matmul (f32 accumulate) -> loosened tolerance vs. f32 reference.
    assert jnp.allclose(out, ref, atol=1e-2, rtol=2e-2), "mismatch vs reference"
    # Output rows must be unit-norm.
    norms = jnp.sqrt(jnp.sum(out * out, axis=1))
    assert jnp.allclose(norms, 1.0, atol=1e-3), "rows not L2-normalized"

    print("KERNEL_OK")
</pallas_src>

<mosaic_0001>
module attributes {stable_mosaic.version = 11 : i64} {
  func.func @_embedder_kernel(%arg0: i32, %arg1: memref<16x768xf32, #tpu.memory_space<vmem>>, %arg2: memref<768x768xbf16, #tpu.memory_space<vmem>>, %arg3: memref<1x768xf32, #tpu.memory_space<vmem>>, %arg4: memref<16x768xf32, #tpu.memory_space<vmem>>) attributes {dimension_semantics = [#tpu.dimension_semantics<parallel>], iteration_bounds = array<i64: 1>, scalar_prefetch = 0 : i64, scratch_operands = 0 : i64, tpu.core_type = #tpu.core_type<tc>, window_params = [{transform_indices = @transform_0, window_bounds = array<i64: 16, 768>}, {pipeline_mode = #tpu.pipeline_mode<synchronous>, transform_indices = @transform_1, window_bounds = array<i64: 768, 768>}, {pipeline_mode = #tpu.pipeline_mode<synchronous>, transform_indices = @transform_2, window_bounds = array<i64: 1, 768>}, {transform_indices = @transform_3, window_bounds = array<i64: 16, 768>}]} {
    %c0 = arith.constant 0 : index
    %c0_0 = arith.constant 0 : index
    %0 = vector.load %arg1[%c0, %c0_0] : memref<16x768xf32, #tpu.memory_space<vmem>>, vector<16x768xf32>
    %1 = arith.truncf %0 : vector<16x768xf32> to vector<16x768xbf16>
    %c0_1 = arith.constant 0 : index
    %c0_2 = arith.constant 0 : index
    %2 = vector.load %arg2[%c0_1, %c0_2] : memref<768x768xbf16, #tpu.memory_space<vmem>>, vector<768x768xbf16>
    %cst = arith.constant dense<0.000000e+00> : vector<16x768xf32>
    %3 = tpu.matmul %1, %2, %cst {dimension_numbers = #tpu.dot_dimension_numbers<[1], [0], [0], [1], [0, 0, 1, 1], [], []>} : vector<16x768xbf16>, vector<768x768xbf16>, vector<16x768xf32> -> vector<16x768xf32>
    %c0_3 = arith.constant 0 : index
    %c0_4 = arith.constant 0 : index
    %4 = vector.load %arg3[%c0_3, %c0_4] : memref<1x768xf32, #tpu.memory_space<vmem>>, vector<1x768xf32>
    %5 = vector.broadcast %4 : vector<1x768xf32> to vector<16x768xf32>
    %6 = arith.addf %3, %5 : vector<16x768xf32>
    %cst_5 = arith.constant 0.000000e+00 : f32
    %7 = vector.broadcast %cst_5 : f32 to vector<16x768xf32>
    %8 = arith.maximumf %6, %7 : vector<16x768xf32>
    %9 = arith.mulf %8, %8 : vector<16x768xf32>
    %cst_6 = arith.constant dense<0.000000e+00> : vector<16xf32>
    %10 = vector.multi_reduction <add>, %9, %cst_6 [1] : vector<16x768xf32> to vector<16xf32>
    %11 = vector.shape_cast %10 : vector<16xf32> to vector<16x1xf32>
    %cst_7 = arith.constant 1.000000e-24 : f32
    %12 = vector.broadcast %cst_7 : f32 to vector<16x1xf32>
    %13 = arith.maximumf %11, %12 : vector<16x1xf32>
    %14 = math.rsqrt %13 : vector<16x1xf32>
    %15 = vector.broadcast %14 : vector<16x1xf32> to vector<16x768xf32>
    %16 = arith.mulf %8, %15 : vector<16x768xf32>
    %c0_8 = arith.constant 0 : index
    %c0_9 = arith.constant 0 : index
    %17 = vector.load %arg4[%c0_8, %c0_9] : memref<16x768xf32, #tpu.memory_space<vmem>>, vector<16x768xf32>
    tpu.vector_store %arg4[%c0_8, %c0_9], %16 {strides = array<i32>} : memref<16x768xf32, #tpu.memory_space<vmem>>, vector<16x768xf32>,
    return
  }
  func.func @transform_0(%arg0: i32) -> (i32, i32) {
    %c0_i32 = arith.constant 0 : i32
    %c0_i32_0 = arith.constant 0 : i32
    return %arg0, %c0_i32 : i32, i32
  }
  func.func @transform_1(%arg0: i32) -> (i32, i32) {
    %c0_i32 = arith.constant 0 : i32
    %c0_i32_0 = arith.constant 0 : i32
    %c0_i32_1 = arith.constant 0 : i32
    return %c0_i32, %c0_i32_0 : i32, i32
  }
  func.func @transform_2(%arg0: i32) -> (i32, i32) {
    %c0_i32 = arith.constant 0 : i32
    %c0_i32_0 = arith.constant 0 : i32
    %c0_i32_1 = arith.constant 0 : i32
    return %c0_i32, %c0_i32_0 : i32, i32
  }
  func.func @transform_3(%arg0: i32) -> (i32, i32) {
    %c0_i32 = arith.constant 0 : i32
    %c0_i32_0 = arith.constant 0 : i32
    return %arg0, %c0_i32 : i32, i32
  }
}

</mosaic_0001>

<bundles_post_ra>
// kernel: tpu_custom_call.1
= control target key start
LH: loop header
LB: loop body
LE: loop exit
PB: predicated region body
PF: predicated region fallthrough
CT: control target
= control target key end

     0   :  { %8 = vsyncpa [#allocation3], 0  ;;  %s4163_s0 = inlined_call_operand.hbm [shape: f32[16,768], index: 0, kind: input, shape index: {}]   ;;  %s4164_s1 = inlined_call_operand.hbm [shape: bf16[768,768], index: 1, kind: input, shape index: {}]   ;;  %s4165_s2 = inlined_call_operand.hbm [shape: f32[1,768], index: 2, kind: input, shape index: {}]   ;;  %s4166_s3 = inlined_call_operand.hbm [shape: f32[16,768], index: 3, kind: output, shape index: {}]  }
   0x1   :  { %9 = vsyncpa [#allocation6], 0  ;;  %s28_s14 = sshll.u32 %s4164_s1, 4  ;;  %s29_s14 = int_to_ptr.hbm [resolvable:$true] %s28_s14 }
   0x2   :  { %10 = vsyncpa [#allocation4], 0  ;;  %s3983_s15 = smov [#allocation5]   ;;  %s15_s19 = sshll.u32 %s4163_s0, 4  ;;  %s16_s19 = int_to_ptr.hbm [resolvable:$true] %s15_s19 }
   0x3   :  { %s30_s16 = sshll.u32 %s3983_s15, 4  ;;  %s3984_s20 = smov 384   ;;  %s31_s16 = int_to_ptr.vmem [resolvable:$true] %s30_s16 }
   0x4   :  { %s3985_s21 = smov 24   ;;  %s3986_s22 = smov [#allocation2]  }
   0x5   :  { %36 = dma.hbm_to_vmem [thread:$0]  %s29_s14, 36864, %s31_s16, [#allocation6], %s3984_s20, %s3984_s20, %s3985_s21  }
   0x6   :  { %s17_s23 = sshll.u32 %s3986_s22, 4  ;;  %s3987_s24 = smov 768   ;;  %s18_s23 = int_to_ptr.vmem [resolvable:$true] %s17_s23 }
   0x7   :  { %s3988_s25 = smov 48   ;;  %s42_s27 = sshll.u32 %s4165_s2, 4  ;;  %s43_s27 = int_to_ptr.hbm [resolvable:$true] %s42_s27 }
   0x8   :  { %23 = dma.hbm_to_vmem [thread:$0]  %s16_s19, 1536, %s18_s23, [#allocation3], %s3987_s24, %s3987_s24, %s3988_s25  }
   0x9   :  { %s3989_s28 = smov [#allocation7]  }
   0xa   :  { %s44_s0 = sshll.u32 %s3989_s28, 4  ;;  %s45_s0 = int_to_ptr.vmem [resolvable:$true] %s44_s0 }
   0xb   :  { %47 = dma.hbm_to_vmem [thread:$0]  %s43_s27, 96, %s45_s0, [#allocation6]  }
   0xc   :  { %3977 = dma.done.wait [#allocation3], 1536  }
   0xd   :  { %3978 = vsyncadd [#allocation3], 4294965760 }
   0xe   :  { %3979 = dma.done.wait [#allocation6], 36960  }
   0xf   :  { %3980 = vsyncadd [#allocation6], 4294930336  ;;  %v2598_v0 = vld [vmem:[#allocation5 + $0x150] sm:$0xf]  ;;  %v3625_v1 = vld [vmem:[#allocation5 + $0x164] sm:$0xf0] }
  0x10   :  { %v2790_v2 = vld [vmem:[#allocation5 + $0x2d0] sm:$0xf]  ;;  %v2599_v3 = vor.u32 %v3625_v1, %v2598_v0  ;;  %v3673_v4 = vld [vmem:[#allocation5 + $0x2e4] sm:$0xf0]  ;;  %v2574_v11 = vld [vmem:[#allocation5 + $0x120] sm:$0xf] }
  0x11   :  { %v2982_v5 = vld [vmem:[#allocation5 + $0x450] sm:$0xf]  ;;  %v3721_v6 = vld [vmem:[#allocation5 + $0x464] sm:$0xf0]  ;;  %v2791_v7 = vor.u32 %v3673_v4, %v2790_v2  ;;  %v3619_v13 = vld [vmem:[#allocation5 + $0x134] sm:$0xf0] }
  0x12   :  { %v2983_v8 = vor.u32 %v3721_v6, %v2982_v5  ;;  %v3174_v9 = vld [vmem:[#allocation5 + $0x5d0] sm:$0xf]  ;;  %v3769_v10 = vld [vmem:[#allocation5 + $0x5e4] sm:$0xf0]  ;;  %1820 = vmatpush.bf16.msra.mxu0 %v2599_v3  ;;  %v2766_v14 = vld [vmem:[#allocation5 + $0x2a0] sm:$0xf]  ;;  %v2575_v16 = vor.u32 %v3619_v13, %v2574_v11 }
  0x13   :  { %v3175_v12 = vor.u32 %v3769_v10, %v3174_v9  ;;  %v3667_v15 = vld [vmem:[#allocation5 + $0x2b4] sm:$0xf0]  ;;  %1834 = vmatpush.bf16.msra.mxu1 %v2791_v7  ;;  %v2958_v18 = vld [vmem:[#allocation5 + $0x420] sm:$0xf]  ;;  %v2550_v23 = vld [vmem:[#allocation5 + $0xf0] sm:$0xf] }
  0x14   :  { %1848 = vmatpush.bf16.msra.mxu2 %v2983_v8  ;;  %v2767_v17 = vor.u32 %v3667_v15, %v2766_v14  ;;  %v3715_v19 = vld [vmem:[#allocation5 + $0x434] sm:$0xf0]  ;;  %v3150_v20 = vld [vmem:[#allocation5 + $0x5a0] sm:$0xf]  ;;  %v3613_v24 = vld [vmem:[#allocation5 + $0x104] sm:$0xf0] }
  0x15   :  { %1862 = vmatpush.bf16.msra.mxu3 %v3175_v12  ;;  %v2959_v21 = vor.u32 %v3715_v19, %v2958_v18  ;;  %v3763_v22 = vld [vmem:[#allocation5 + $0x5b4] sm:$0xf0]  ;;  %v2742_v26 = vld [vmem:[#allocation5 + $0x270] sm:$0xf]  ;;  %v3661_v27 = vld [vmem:[#allocation5 + $0x284] sm:$0xf0]  ;;  %v2551_v29 = vor.u32 %v3613_v24, %v2550_v23 }
  0x16   :  { %v3151_v25 = vor.u32 %v3763_v22, %v3150_v20  ;;  %v2934_v28 = vld [vmem:[#allocation5 + $0x3f0] sm:$0xf]  ;;  %1821 = vmatpush.bf16.msra.mxu0 %v2575_v16  ;;  %v3709_v30 = vld [vmem:[#allocation5 + $0x404] sm:$0xf0]  ;;  %v2743_v33 = vor.u32 %v3661_v27, %v2742_v26  ;;  %v2526_v35 = vld [vmem:[#allocation5 + $0xc0] sm:$0xf] }
  0x17   :  { %v3126_v31 = vld [vmem:[#allocation5 + $0x570] sm:$0xf]  ;;  %v3757_v32 = vld [vmem:[#allocation5 + $0x584] sm:$0xf0]  ;;  %1835 = vmatpush.bf16.msra.mxu1 %v2767_v17  ;;  %v2935_v34 = vor.u32 %v3709_v30, %v2934_v28  ;;  %v3607_v36 = vld [vmem:[#allocation5 + $0xd4] sm:$0xf0] }
  0x18   :  { %1849 = vmatpush.bf16.msra.mxu2 %v2959_v21  ;;  %v2718_v37 = vld [vmem:[#allocation5 + $0x240] sm:$0xf]  ;;  %v3127_v38 = vor.u32 %v3757_v32, %v3126_v31  ;;  %v3655_v39 = vld [vmem:[#allocation5 + $0x254] sm:$0xf0]  ;;  %v2527_v44 = vor.u32 %v3607_v36, %v2526_v35  ;;  %v2502_v47 = vld [vmem:[#allocation5 + $0x90] sm:$0xf] }
  0x19   :  { %1863 = vmatpush.bf16.msra.mxu3 %v3151_v25  ;;  %v2910_v40 = vld [vmem:[#allocation5 + $0x3c0] sm:$0xf]  ;;  %v3703_v41 = vld [vmem:[#allocation5 + $0x3d4] sm:$0xf0]  ;;  %v2719_v45 = vor.u32 %v3655_v39, %v2718_v37  ;;  %v3601_v48 = vld [vmem:[#allocation5 + $0xa4] sm:$0xf0] }
  0x1a   :  { %v3102_v42 = vld [vmem:[#allocation5 + $0x540] sm:$0xf]  ;;  %v3751_v43 = vld [vmem:[#allocation5 + $0x554] sm:$0xf0]  ;;  %1822 = vmatpush.bf16.msra.mxu0 %v2551_v29  ;;  %v2911_v46 = vor.u32 %v3703_v41, %v2910_v40  ;;  %v2694_v49 = vld [vmem:[#allocation5 + $0x210] sm:$0xf]  ;;  %v2503_v56 = vor.u32 %v3601_v48, %v2502_v47 }
  0x1b   :  { %1836 = vmatpush.bf16.msra.mxu1 %v2743_v33  ;;  %v3103_v50 = vor.u32 %v3751_v43, %v3102_v42  ;;  %v3649_v51 = vld [vmem:[#allocation5 + $0x224] sm:$0xf0]  ;;  %v2886_v52 = vld [vmem:[#allocation5 + $0x390] sm:$0xf]  ;;  %v2478_v59 = vld [vmem:[#allocation5 + $0x60] sm:$0xf] }
  0x1c   :  { %1850 = vmatpush.bf16.msra.mxu2 %v2935_v34  ;;  %v3697_v53 = vld [vmem:[#allocation5 + $0x3a4] sm:$0xf0]  ;;  %v3078_v54 = vld [vmem:[#allocation5 + $0x510] sm:$0xf]  ;;  %v2695_v57 = vor.u32 %v3649_v51, %v2694_v49  ;;  %v3595_v60 = vld [vmem:[#allocation5 + $0x74] sm:$0xf0] }
  0x1d   :  { %1864 = vmatpush.bf16.msra.mxu3 %v3127_v38  ;;  %v3745_v55 = vld [vmem:[#allocation5 + $0x524] sm:$0xf0]  ;;  %v2887_v58 = vor.u32 %v3697_v53, %v2886_v52  ;;  %v2670_v61 = vld [vmem:[#allocation5 + $0x1e0] sm:$0xf]  ;;  %v3643_v63 = vld [vmem:[#allocation5 + $0x1f4] sm:$0xf0]  ;;  %v2479_v4 = vor.u32 %v3595_v60, %v2478_v59 }
  0x1e   :  { %1823 = vmatpush.bf16.msra.mxu0 %v2527_v44  ;;  %v3079_v62 = vor.u32 %v3745_v55, %v3078_v54  ;;  %v2862_v0 = vld [vmem:[#allocation5 + $0x360] sm:$0xf]  ;;  %v3691_v1 = vld [vmem:[#allocation5 + $0x374] sm:$0xf0]  ;;  %v2671_v5 = vor.u32 %v3643_v63, %v2670_v61  ;;  %v2454_v7 = vld [vmem:[#allocation5 + $0x30] sm:$0xf] }
  0x1f   :  { %1837 = vmatpush.bf16.msra.mxu1 %v2719_v45  ;;  %v3054_v2 = vld [vmem:[#allocation5 + $0x4e0] sm:$0xf]  ;;  %v3739_v3 = vld [vmem:[#allocation5 + $0x4f4] sm:$0xf0]  ;;  %v2863_v6 = vor.u32 %v3691_v1, %v2862_v0  ;;  %v3589_v8 = vld [vmem:[#allocation5 + $0x44] sm:$0xf0] }
  0x20   :  { %1851 = vmatpush.bf16.msra.mxu2 %v2911_v46  ;;  %v2646_v9 = vld [vmem:[#allocation5 + $0x1b0] sm:$0xf]  ;;  %v3055_v10 = vor.u32 %v3739_v3, %v3054_v2  ;;  %v3637_v11 = vld [vmem:[#allocation5 + $0x1c4] sm:$0xf0]  ;;  %v2455_v16 = vor.u32 %v3589_v8, %v2454_v7  ;;  %v2430_v17 = vld [vmem:[#allocation5] sm:$0xf] }
  0x21   :  { %1865 = vmatpush.bf16.msra.mxu3 %v3103_v50  ;;  %v2838_v12 = vld [vmem:[#allocation5 + $0x330] sm:$0xf]  ;;  %v3685_v13 = vld [vmem:[#allocation5 + $0x344] sm:$0xf0]  ;;  %v3583_v18 = vld [vmem:[#allocation5 + $0x14] sm:$0xf0]  ;;  %v2647_v19 = vor.u32 %v3637_v11, %v2646_v9 }
  0x22   :  { %1824 = vmatpush.bf16.msra.mxu0 %v2503_v56  ;;  %v3030_v14 = vld [vmem:[#allocation5 + $0x4b0] sm:$0xf]  ;;  %v3733_v15 = vld [vmem:[#allocation5 + $0x4c4] sm:$0xf0]  ;;  %v2839_v20 = vor.u32 %v3685_v13, %v2838_v12  ;;  %v2622_v21 = vld [vmem:[#allocation5 + $0x180] sm:$0xf]  ;;  %v2431_v31 = vor.u32 %v3583_v18, %v2430_v17 }
  0x23   :  { %1838 = vmatpush.bf16.msra.mxu1 %v2695_v57  ;;  %v3631_v22 = vld [vmem:[#allocation5 + $0x194] sm:$0xf0]  ;;  %v2814_v23 = vld [vmem:[#allocation5 + $0x300] sm:$0xf]  ;;  %v3031_v24 = vor.u32 %v3733_v15, %v3030_v14  ;;  %v3366_v28 = vld [vmem:[#allocation5 + $0x750] sm:$0xf] }
  0x24   :  { %1852 = vmatpush.bf16.msra.mxu2 %v2887_v58  ;;  %v3679_v25 = vld [vmem:[#allocation5 + $0x314] sm:$0xf0]  ;;  %v3006_v26 = vld [vmem:[#allocation5 + $0x480] sm:$0xf]  ;;  %v3817_v29 = vld [vmem:[#allocation5 + $0x764] sm:$0xf0]  ;;  %v2623_v35 = vor.u32 %v3631_v22, %v2622_v21 }
  0x25   :  { %1866 = vmatpush.bf16.msra.mxu3 %v3079_v62  ;;  %v3727_v27 = vld [vmem:[#allocation5 + $0x494] sm:$0xf0]  ;;  %v3558_v30 = vld [vmem:[#allocation5 + $0x8d0] sm:$0xf]  ;;  %v3865_v32 = vld [vmem:[#allocation5 + $0x8e4] sm:$0xf0]  ;;  %v2815_v36 = vor.u32 %v3679_v25, %v2814_v23  ;;  %v3367_v40 = vor.u32 %v3817_v29, %v3366_v28 }
  0x26   :  { %1825 = vmatpush.bf16.msra.mxu0 %v2479_v4  ;;  %v3622_v33 = vld [vmem:[#allocation5 + $0x154] sm:$0xf]  ;;  %v2600_v34 = vld [vmem:[#allocation5 + $0x168] sm:$0xf0]  ;;  %v3007_v39 = vor.u32 %v3727_v27, %v3006_v26  ;;  %v3342_v41 = vld [vmem:[#allocation5 + $0x720] sm:$0xf]  ;;  %v3559_v42 = vor.u32 %v3865_v32, %v3558_v30 }
  0x27   :  { %1839 = vmatpush.bf16.msra.mxu1 %v2671_v5  ;;  %v3670_v37 = vld [vmem:[#allocation5 + $0x2d4] sm:$0xf]  ;;  %v2792_v38 = vld [vmem:[#allocation5 + $0x2e8] sm:$0xf0]  ;;  %v2603_v43 = vor.u32 %v3622_v33, %v2600_v34  ;;  %v3811_v44 = vld [vmem:[#allocation5 + $0x734] sm:$0xf0] }
  0x28   :  { %1853 = vmatpush.bf16.msra.mxu2 %v2863_v6  ;;  %v3534_v45 = vld [vmem:[#allocation5 + $0x8a0] sm:$0xf]  ;;  %v3859_v46 = vld [vmem:[#allocation5 + $0x8b4] sm:$0xf0]  ;;  %v2795_v47 = vor.u32 %v3670_v37, %v2792_v38  ;;  %v3616_v48 = vld [vmem:[#allocation5 + $0x124] sm:$0xf]  ;;  %v3343_v54 = vor.u32 %v3811_v44, %v3342_v41 }
  0x29   :  { %1867 = vmatpush.bf16.msra.mxu3 %v3055_v10  ;;  %v2576_v49 = vld [vmem:[#allocation5 + $0x138] sm:$0xf0]  ;;  %v3664_v50 = vld [vmem:[#allocation5 + $0x2a4] sm:$0xf]  ;;  %v66_v53 = vld [vmem:[#allocation2 + $0x30] sm:$0xff]  ;;  %v3535_v58 = vor.u32 %v3859_v46, %v3534_v45  ;;  %s3990_s2 = smov [#allocation8]  }
  0x2a   :  { %1826 = vmatpush.bf16.msra.mxu0 %v2455_v16  ;;  %v2768_v51 = vld [vmem:[#allocation5 + $0x2b8] sm:$0xf0]  ;;  %v60_v52 = vld [vmem:[#allocation2] sm:$0xff]  ;;  %v3318_v55 = vld [vmem:[#allocation5 + $0x6f0] sm:$0xf]  ;;  %v2579_v59 = vor.u32 %v3616_v48, %v2576_v49  ;;  %s2412_s29 = sshll.u32 %s3990_s2, 4  ;;  %s2413_s29 = int_to_ptr.vmem [resolvable:$true] %s2412_s29 }
  0x2b   :  { %1840 = vmatpush.bf16.msra.mxu1 %v2647_v19  ;;  %v3805_v56 = vld [vmem:[#allocation5 + $0x704] sm:$0xf0]  ;;  %v4023_v57 = vpack.c.bf16 %v66_v53, %v60_v52  ;;  %v3510_v60 = vld [vmem:[#allocation5 + $0x870] sm:$0xf]  ;;  %v3610_v62 = vld [vmem:[#allocation5 + $0xf4] sm:$0xf]  ;;  %v2771_v63 = vor.u32 %v3664_v50, %v2768_v51 }
  0x2c   :  { %1854 = vmatpush.bf16.msra.mxu2 %v2839_v20  ;;  %v3853_v61 = vld [vmem:[#allocation5 + $0x884] sm:$0xf0]  ;;  %v2552_v0 = vld [vmem:[#allocation5 + $0x108] sm:$0xf0]  ;;  %v67_v2 = vld [vmem:[#allocation2 + $0x38] sm:$0xff]  ;;  %v3319_v7 = vor.u32 %v3805_v56, %v3318_v55  ;;  %s2414_s5 = sshll.u32 %s4166_s3, 4  ;;  %s2415_s5 = int_to_ptr.hbm [resolvable:$true] %s2414_s5 }
  0x2d   :  { %1868 = vmatpush.bf16.msra.mxu3 %v3031_v24  ;;  %v61_v1 = vld [vmem:[#allocation2 + $0x8] sm:$0xff]  ;;  %v3658_v3 = vld [vmem:[#allocation5 + $0x274] sm:$0xf]  ;;  %v3294_v5 = vld [vmem:[#allocation5 + $0x6c0] sm:$0xf]  ;;  %v3511_v11 = vor.u32 %v3853_v61, %v3510_v60  ;;  %v2555_v12 = vor.u32 %v3610_v62, %v2552_v0 }
  0x2e   :  { %1827 = vmatpush.bf16.msra.mxu0 %v2431_v31  ;;  %v2744_v4 = vld [vmem:[#allocation5 + $0x288] sm:$0xf0]  ;;  %v4026_v6 = vpack.c.bf16 %v67_v2, %v61_v1  ;;  %v3799_v8 = vld [vmem:[#allocation5 + $0x6d4] sm:$0xf0]  ;;  %v3486_v9 = vld [vmem:[#allocation5 + $0x840] sm:$0xf] }
  0x2f   :  { %1841 = vmatpush.bf16.msra.mxu1 %v2623_v35  ;;  %v3847_v10 = vld [vmem:[#allocation5 + $0x854] sm:$0xf0]  ;;  %v3604_v13 = vld [vmem:[#allocation5 + $0xc4] sm:$0xf]  ;;  %v2528_v14 = vld [vmem:[#allocation5 + $0xd8] sm:$0xf0]  ;;  %v2747_v16 = vor.u32 %v3658_v3, %v2744_v4  ;;  %v3295_v24 = vor.u32 %v3799_v8, %v3294_v5 }
  0x30   :  { %1855 = vmatpush.bf16.msra.mxu2 %v2815_v36  ;;  %v62_v15 = vld [vmem:[#allocation2 + $0x10] sm:$0xff]  ;;  %v68_v17 = vld [vmem:[#allocation2 + $0x40] sm:$0xff]  ;;  %v63_v18 = vld [vmem:[#allocation2 + $0x18] sm:$0xff]  ;;  %v3487_v25 = vor.u32 %v3847_v10, %v3486_v9  ;;  %v2531_v26 = vor.u32 %v3604_v13, %v2528_v14 }
  0x31   :  { %1869 = vmatpush.bf16.msra.mxu3 %v3007_v39  ;;  %1828 = vmatmul.bf16.vlgmr.msra.gmra.mxu0 %v4023_v57  ;;  %v69_v19 = vld [vmem:[#allocation2 + $0x48] sm:$0xff]  ;;  %v3652_v20 = vld [vmem:[#allocation5 + $0x244] sm:$0xf]  ;;  %v2720_v21 = vld [vmem:[#allocation5 + $0x258] sm:$0xf0]  ;;  %v4029_v22 = vpack.c.bf16 %v68_v17, %v62_v15 }
  0x32   :  { %1876 = vmatpush.bf16.msrb.mxu0 %v3367_v40  ;;  %1842 = vmatmul.bf16.vlgmr.msra.gmra.mxu1 %v4026_v6  ;;  %v4031_v23 = vpack.c.bf16 %v69_v19, %v63_v18  ;;  %v3270_v27 = vld [vmem:[#allocation5 + $0x690] sm:$0xf]  ;;  %v3793_v28 = vld [vmem:[#allocation5 + $0x6a4] sm:$0xf0]  ;;  %v2723_v30 = vor.u32 %v3652_v20, %v2720_v21  ;;  %v3598_v32 = vld [vmem:[#allocation5 + $0x94] sm:$0xf] }
  0x33   :  { %1890 = vmatpush.bf16.msrb.mxu1 %v3559_v42  ;;  %v3462_v29 = vld [vmem:[#allocation5 + $0x810] sm:$0xf]  ;;  %v3841_v31 = vld [vmem:[#allocation5 + $0x824] sm:$0xf0]  ;;  %v2504_v33 = vld [vmem:[#allocation5 + $0xa8] sm:$0xf0]  ;;  %1856 = vmatmul.bf16.vlgmr.msra.gmra.mxu2 %v4029_v22  ;;  %v3271_v36 = vor.u32 %v3793_v28, %v3270_v27 }
  0x34   :  { %1904 = vmatpush.bf16.msrb.mxu2 %v2603_v43  ;;  %v3646_v34 = vld [vmem:[#allocation5 + $0x214] sm:$0xf]  ;;  %v2696_v35 = vld [vmem:[#allocation5 + $0x228] sm:$0xf0]  ;;  %1870 = vmatmul.bf16.vlgmr.msra.gmra.mxu3 %v4031_v23  ;;  %v3463_v37 = vor.u32 %v3841_v31, %v3462_v29  ;;  %v2507_v38 = vor.u32 %v3598_v32, %v2504_v33  ;;  %v3246_v39 = vld [vmem:[#allocation5 + $0x660] sm:$0xf] }
  0x35   :  { %1918 = vmatpush.bf16.msrb.mxu3 %v2795_v47  ;;  %v3787_v40 = vld [vmem:[#allocation5 + $0x674] sm:$0xf0]  ;;  %v3438_v41 = vld [vmem:[#allocation5 + $0x7e0] sm:$0xf]  ;;  %v2699_v42 = vor.u32 %v3646_v34, %v2696_v35  ;;  %v3592_v44 = vld [vmem:[#allocation5 + $0x64] sm:$0xf] }
  0x36   :  { %1877 = vmatpush.bf16.msrb.mxu0 %v3343_v54  ;;  %v3835_v43 = vld [vmem:[#allocation5 + $0x7f4] sm:$0xf0]  ;;  %v2480_v45 = vld [vmem:[#allocation5 + $0x78] sm:$0xf0]  ;;  %v3640_v46 = vld [vmem:[#allocation5 + $0x1e4] sm:$0xf]  ;;  %v3247_v48 = vor.u32 %v3787_v40, %v3246_v39 }
  0x37   :  { %1891 = vmatpush.bf16.msrb.mxu1 %v3535_v58  ;;  %v2672_v47 = vld [vmem:[#allocation5 + $0x1f8] sm:$0xf0]  ;;  %v3439_v49 = vor.u32 %v3835_v43, %v3438_v41  ;;  %v2483_v50 = vor.u32 %v3592_v44, %v2480_v45  ;;  %v3222_v51 = vld [vmem:[#allocation5 + $0x630] sm:$0xf]  ;;  %v3781_v52 = vld [vmem:[#allocation5 + $0x644] sm:$0xf0] }
  0x38   :  { %1905 = vmatpush.bf16.msrb.mxu2 %v2579_v59  ;;  %v3414_v53 = vld [vmem:[#allocation5 + $0x7b0] sm:$0xf]  ;;  %v2675_v54 = vor.u32 %v3640_v46, %v2672_v47  ;;  %v3829_v55 = vld [vmem:[#allocation5 + $0x7c4] sm:$0xf0]  ;;  %v3586_v56 = vld [vmem:[#allocation5 + $0x34] sm:$0xf]  ;;  %v3223_v61 = vor.u32 %v3781_v52, %v3222_v51 }
  0x39   :  { %1919 = vmatpush.bf16.msrb.mxu3 %v2771_v63  ;;  %v2456_v58 = vld [vmem:[#allocation5 + $0x48] sm:$0xf0]  ;;  %v3634_v59 = vld [vmem:[#allocation5 + $0x1b4] sm:$0xf]  ;;  %v3198_v62 = vld [vmem:[#allocation5 + $0x600] sm:$0xf]  ;;  %v3415_v1 = vor.u32 %v3829_v55, %v3414_v53 }
  0x3a   :  { %1878 = vmatpush.bf16.msrb.mxu0 %v3319_v7  ;;  %v2648_v60 = vld [vmem:[#allocation5 + $0x1c8] sm:$0xf0]  ;;  %v3775_v63 = vld [vmem:[#allocation5 + $0x614] sm:$0xf0]  ;;  %v3390_v0 = vld [vmem:[#allocation5 + $0x780] sm:$0xf]  ;;  %v2459_v2 = vor.u32 %v3586_v56, %v2456_v58 }
  0x3b   :  { %1892 = vmatpush.bf16.msrb.mxu1 %v3511_v11  ;;  %v3823_v3 = vld [vmem:[#allocation5 + $0x794] sm:$0xf0]  ;;  %v3580_v4 = vld [vmem:[#allocation5 + $0x4] sm:$0xf]  ;;  %v2432_v5 = vld [vmem:[#allocation5 + $0x18] sm:$0xf0]  ;;  %v2651_v7 = vor.u32 %v3634_v59, %v2648_v60  ;;  %v3199_v14 = vor.u32 %v3775_v63, %v3198_v62 }
  0x3c   :  { %1906 = vmatpush.bf16.msrb.mxu2 %v2555_v12  ;;  %v3628_v8 = vld [vmem:[#allocation5 + $0x184] sm:$0xf]  ;;  %v2624_v9 = vld [vmem:[#allocation5 + $0x198] sm:$0xf0]  ;;  %v3718_v10 = vld [vmem:[#allocation5 + $0x454] sm:$0xf]  ;;  %v3391_v18 = vor.u32 %v3823_v3, %v3390_v0  ;;  %v2435_v19 = vor.u32 %v3580_v4, %v2432_v5 }
  0x3d   :  { %1920 = vmatpush.bf16.msrb.mxu3 %v2747_v16  ;;  %v2984_v11 = vld [vmem:[#allocation5 + $0x468] sm:$0xf0]  ;;  %v3766_v12 = vld [vmem:[#allocation5 + $0x5d4] sm:$0xf]  ;;  %v64_v21 = vld [vmem:[#allocation2 + $0x20] sm:$0xff] }
  0x3e   :  { %1879 = vmatpush.bf16.msrb.mxu0 %v3295_v24  ;;  %v3176_v13 = vld [vmem:[#allocation5 + $0x5e8] sm:$0xf0]  ;;  %v3814_v15 = vld [vmem:[#allocation5 + $0x754] sm:$0xf]  ;;  %v71_v28 = vld [vmem:[#allocation2 + $0x58] sm:$0xff] }
  0x3f   :  { %1893 = vmatpush.bf16.msrb.mxu1 %v3487_v25  ;;  %v3368_v16 = vld [vmem:[#allocation5 + $0x768] sm:$0xf0]  ;;  %v3862_v17 = vld [vmem:[#allocation5 + $0x8d4] sm:$0xf]  ;;  %v2627_v25 = vor.u32 %v3628_v8, %v2624_v9  ;;  %v3179_v29 = vor.u32 %v3766_v12, %v3176_v13  ;;  %v3712_v31 = vld [vmem:[#allocation5 + $0x424] sm:$0xf] }
  0x40   :  { %1907 = vmatpush.bf16.msrb.mxu2 %v2531_v26  ;;  %v3560_v20 = vld [vmem:[#allocation5 + $0x8e8] sm:$0xf0]  ;;  %v70_v24 = vld [vmem:[#allocation2 + $0x50] sm:$0xff]  ;;  %v2987_v26 = vor.u32 %v3718_v10, %v2984_v11  ;;  %v2960_v32 = vld [vmem:[#allocation5 + $0x438] sm:$0xf0] }
  0x41   :  { %1921 = vmatpush.bf16.msrb.mxu3 %v2723_v30  ;;  %v65_v27 = vld [vmem:[#allocation2 + $0x28] sm:$0xff]  ;;  %v3371_v30 = vor.u32 %v3814_v15, %v3368_v16  ;;  %v3760_v33 = vld [vmem:[#allocation5 + $0x5a4] sm:$0xf]  ;;  %v3563_v34 = vor.u32 %v3862_v17, %v3560_v20  ;;  %v4035_v35 = vpack.c.bf16 %v70_v24, %v64_v21  ;;  %v3536_v41 = vld [vmem:[#allocation5 + $0x8b8] sm:$0xf0] }
  0x42   :  { %1880 = vmatpush.bf16.msrb.mxu0 %v3271_v36  ;;  %v3152_v36 = vld [vmem:[#allocation5 + $0x5b8] sm:$0xf0]  ;;  %v4037_v39 = vpack.c.bf16 %v71_v28, %v65_v27  ;;  %v3856_v40 = vld [vmem:[#allocation5 + $0x8a4] sm:$0xf]  ;;  %v3706_v45 = vld [vmem:[#allocation5 + $0x3f4] sm:$0xf] }
  0x43   :  { %1894 = vmatpush.bf16.msrb.mxu1 %v3463_v37  ;;  %v3808_v37 = vld [vmem:[#allocation5 + $0x724] sm:$0xf]  ;;  %v3155_v43 = vor.u32 %v3760_v33, %v3152_v36  ;;  %v2936_v46 = vld [vmem:[#allocation5 + $0x408] sm:$0xf0]  ;;  %v3754_v47 = vld [vmem:[#allocation5 + $0x574] sm:$0xf] }
  0x44   :  { %1908 = vmatpush.bf16.msrb.mxu2 %v2507_v38  ;;  %v3344_v38 = vld [vmem:[#allocation5 + $0x738] sm:$0xf0]  ;;  %v3320_v51 = vld [vmem:[#allocation5 + $0x708] sm:$0xf0]  ;;  %v3850_v52 = vld [vmem:[#allocation5 + $0x874] sm:$0xf] }
  0x45   :  { %1922 = vmatpush.bf16.msrb.mxu3 %v2699_v42  ;;  %v2963_v42 = vor.u32 %v3712_v31, %v2960_v32  ;;  %v3347_v44 = vor.u32 %v3808_v37, %v3344_v38  ;;  %v3512_v53 = vld [vmem:[#allocation5 + $0x888] sm:$0xf0]  ;;  %v3700_v58 = vld [vmem:[#allocation5 + $0x3c4] sm:$0xf]  ;;  %v2912_v59 = vld [vmem:[#allocation5 + $0x3d8] sm:$0xf0] }
  0x46   :  { %1881 = vmatpush.bf16.msrb.mxu0 %v3247_v48  ;;  %v3539_v48 = vor.u32 %v3856_v40, %v3536_v41  ;;  %v3748_v60 = vld [vmem:[#allocation5 + $0x544] sm:$0xf]  ;;  %v3104_v62 = vld [vmem:[#allocation5 + $0x558] sm:$0xf0]  ;;  %v2915_v3 = vor.u32 %v3700_v58, %v2912_v59  ;;  %v2888_v8 = vld [vmem:[#allocation5 + $0x3a8] sm:$0xf0] }
  0x47   :  { %1895 = vmatpush.bf16.msrb.mxu1 %v3439_v49  ;;  %v3128_v49 = vld [vmem:[#allocation5 + $0x588] sm:$0xf0]  ;;  %v3796_v63 = vld [vmem:[#allocation5 + $0x6c4] sm:$0xf]  ;;  %v3296_v0 = vld [vmem:[#allocation5 + $0x6d8] sm:$0xf0]  ;;  %v3107_v4 = vor.u32 %v3748_v60, %v3104_v62 }
  0x48   :  { %1909 = vmatpush.bf16.msrb.mxu2 %v2483_v50  ;;  %v3802_v50 = vld [vmem:[#allocation5 + $0x6f4] sm:$0xf]  ;;  %v3131_v55 = vor.u32 %v3754_v47, %v3128_v49  ;;  %v3299_v5 = vor.u32 %v3796_v63, %v3296_v0  ;;  %v3080_v11 = vld [vmem:[#allocation5 + $0x528] sm:$0xf0]  ;;  %v2864_v20 = vld [vmem:[#allocation5 + $0x378] sm:$0xf0] }
  0x49   :  { %1923 = vmatpush.bf16.msrb.mxu3 %v2675_v54  ;;  %v2939_v54 = vor.u32 %v3706_v45, %v2936_v46  ;;  %v3323_v56 = vor.u32 %v3802_v50, %v3320_v51  ;;  %v3742_v9 = vld [vmem:[#allocation5 + $0x514] sm:$0xf]  ;;  %v3272_v13 = vld [vmem:[#allocation5 + $0x6a8] sm:$0xf0]  ;;  %v3736_v21 = vld [vmem:[#allocation5 + $0x4e4] sm:$0xf] }
  0x4a   :  { %1882 = vmatpush.bf16.msrb.mxu0 %v3223_v61  ;;  %v3515_v61 = vor.u32 %v3850_v52, %v3512_v53  ;;  %v3790_v12 = vld [vmem:[#allocation5 + $0x694] sm:$0xf]  ;;  %v3464_v15 = vld [vmem:[#allocation5 + $0x828] sm:$0xf0]  ;;  %v3083_v17 = vor.u32 %v3742_v9, %v3080_v11  ;;  %v3248_v27 = vld [vmem:[#allocation5 + $0x678] sm:$0xf0] }
  0x4b   :  { %1896 = vmatpush.bf16.msrb.mxu1 %v3415_v1  ;;  %v3844_v1 = vld [vmem:[#allocation5 + $0x844] sm:$0xf]  ;;  %v3682_v33 = vld [vmem:[#allocation5 + $0x334] sm:$0xf]  ;;  %v3032_v38 = vld [vmem:[#allocation5 + $0x4c8] sm:$0xf0] }
  0x4c   :  { %1910 = vmatpush.bf16.msrb.mxu2 %v2459_v2  ;;  %v3488_v2 = vld [vmem:[#allocation5 + $0x858] sm:$0xf0]  ;;  %v3832_v28 = vld [vmem:[#allocation5 + $0x7e4] sm:$0xf]  ;;  %v3730_v36 = vld [vmem:[#allocation5 + $0x4b4] sm:$0xf] }
  0x4d   :  { %1924 = vmatpush.bf16.msrb.mxu3 %v2651_v7  ;;  %v3694_v7 = vld [vmem:[#allocation5 + $0x394] sm:$0xf]  ;;  %v3491_v10 = vor.u32 %v3844_v1, %v3488_v2  ;;  %v3224_v41 = vld [vmem:[#allocation5 + $0x648] sm:$0xf0]  ;;  %v3676_v45 = vld [vmem:[#allocation5 + $0x304] sm:$0xf]  ;;  %v3035_v47 = vor.u32 %v3730_v36, %v3032_v38 }
  0x4e   :  { %1883 = vmatpush.bf16.msrb.mxu0 %v3199_v14  ;;  %v3838_v14 = vld [vmem:[#allocation5 + $0x814] sm:$0xf]  ;;  %v2891_v16 = vor.u32 %v3694_v7, %v2888_v8  ;;  %v2816_v46 = vld [vmem:[#allocation5 + $0x318] sm:$0xf0]  ;;  %v3724_v49 = vld [vmem:[#allocation5 + $0x484] sm:$0xf] }
  0x4f   :  { %1897 = vmatpush.bf16.msrb.mxu1 %v3391_v18  ;;  %v3275_v18 = vor.u32 %v3790_v12, %v3272_v13  ;;  %v3467_v24 = vor.u32 %v3838_v14, %v3464_v15  ;;  %v3778_v40 = vld [vmem:[#allocation5 + $0x634] sm:$0xf]  ;;  %v3008_v50 = vld [vmem:[#allocation5 + $0x498] sm:$0xf0]  ;;  %v3772_v51 = vld [vmem:[#allocation5 + $0x604] sm:$0xf]  ;;  %v2819_v60 = vor.u32 %v3676_v45, %v2816_v46 }
  0x50   :  { %1911 = vmatpush.bf16.msrb.mxu2 %v2435_v19  ;;  %v3688_v19 = vld [vmem:[#allocation5 + $0x364] sm:$0xf]  ;;  %v3200_v53 = vld [vmem:[#allocation5 + $0x618] sm:$0xf0]  ;;  %v3626_v58 = vld [vmem:[#allocation5 + $0x16c] sm:$0xf0]  ;;  %v3011_v0 = vor.u32 %v3724_v49, %v3008_v50 }
  0x51   :  { %1925 = vmatpush.bf16.msrb.mxu3 %v2627_v25  ;;  %1884 = vmatmul.bf16.vlgmr.msrb.gmra.mxu0 %v4035_v35  ;;  %v3056_v25 = vld [vmem:[#allocation5 + $0x4f8] sm:$0xf0]  ;;  %v2798_v59 = vld [vmem:[#allocation5 + $0x2d8] sm:$0xf]  ;;  %v3722_v63 = vld [vmem:[#allocation5 + $0x46c] sm:$0xf0]  ;;  %v3203_v1 = vor.u32 %v3772_v51, %v3200_v53 }
  0x52   :  { %1932 = vmatpush.bf16.msra.mxu0 %v2987_v26  ;;  %1898 = vmatmul.bf16.vlgmr.msrb.gmra.mxu1 %v4037_v39  ;;  %v3784_v26 = vld [vmem:[#allocation5 + $0x664] sm:$0xf]  ;;  %v3059_v31 = vor.u32 %v3736_v21, %v3056_v25  ;;  %v2990_v62 = vld [vmem:[#allocation5 + $0x458] sm:$0xf]  ;;  %v2582_v9 = vld [vmem:[#allocation5 + $0x128] sm:$0xf] }
  0x53   :  { %1946 = vmatpush.bf16.msra.mxu1 %v3179_v29  ;;  %1912 = vmatmul.bf16.vlgmr.msrb.gmra.mxu2 %v4023_v57  ;;  %v3440_v29 = vld [vmem:[#allocation5 + $0x7f8] sm:$0xf0]  ;;  %v3251_v32 = vor.u32 %v3784_v26, %v3248_v27  ;;  %v3182_v2 = vld [vmem:[#allocation5 + $0x5d8] sm:$0xf]  ;;  %v2991_v8 = vor.u32 %v3722_v63, %v2990_v62  ;;  %v2774_v11 = vld [vmem:[#allocation5 + $0x2a8] sm:$0xf] }
  0x54   :  { %1960 = vmatpush.bf16.msra.mxu2 %v3371_v30  ;;  %1926 = vmatmul.bf16.vlgmr.msrb.gmra.mxu3 %v4026_v6  ;;  %v2867_v30 = vor.u32 %v3688_v19, %v2864_v20  ;;  %v3443_v37 = vor.u32 %v3832_v28, %v3440_v29  ;;  %v3668_v13 = vld [vmem:[#allocation5 + $0x2bc] sm:$0xf0]  ;;  %v2966_v14 = vld [vmem:[#allocation5 + $0x428] sm:$0xf]  ;;  %v2558_v21 = vld [vmem:[#allocation5 + $0xf8] sm:$0xf] }
  0x55   :  { %1974 = vmatpush.bf16.msra.mxu3 %v3563_v34  ;;  %v2840_v34 = vld [vmem:[#allocation5 + $0x348] sm:$0xf0]  ;;  %v3716_v15 = vld [vmem:[#allocation5 + $0x43c] sm:$0xf0]  ;;  %v2775_v19 = vor.u32 %v3668_v13, %v2774_v11  ;;  %v2750_v25 = vld [vmem:[#allocation5 + $0x278] sm:$0xf] }
  0x56   :  { %1933 = vmatpush.bf16.msra.mxu0 %v2963_v42  ;;  %v3826_v42 = vld [vmem:[#allocation5 + $0x7b4] sm:$0xf]  ;;  %v2967_v20 = vor.u32 %v3716_v15, %v2966_v14  ;;  %v3662_v27 = vld [vmem:[#allocation5 + $0x28c] sm:$0xf0]  ;;  %v2942_v28 = vld [vmem:[#allocation5 + $0x3f8] sm:$0xf] }
  0x57   :  { %1947 = vmatpush.bf16.msra.mxu1 %v3155_v43  ;;  %v3416_v43 = vld [vmem:[#allocation5 + $0x7c8] sm:$0xf0]  ;;  %v3710_v29 = vld [vmem:[#allocation5 + $0x40c] sm:$0xf0]  ;;  %v2534_v36 = vld [vmem:[#allocation5 + $0xc8] sm:$0xf] }
  0x58   :  { %1961 = vmatpush.bf16.msra.mxu2 %v3347_v44  ;;  %v2843_v44 = vor.u32 %v3682_v33, %v2840_v34  ;;  %v3419_v52 = vor.u32 %v3826_v42, %v3416_v43  ;;  %v2751_v33 = vor.u32 %v3662_v27, %v2750_v25  ;;  %v2943_v34 = vor.u32 %v3710_v29, %v2942_v28  ;;  %v2726_v38 = vld [vmem:[#allocation5 + $0x248] sm:$0xf]  ;;  %v3704_v43 = vld [vmem:[#allocation5 + $0x3dc] sm:$0xf0]  ;;  %v2510_v49 = vld [vmem:[#allocation5 + $0x98] sm:$0xf] }
  0x59   :  { %1975 = vmatpush.bf16.msra.mxu3 %v3539_v48  ;;  %v3227_v48 = vor.u32 %v3778_v40, %v3224_v41  ;;  %v3656_v41 = vld [vmem:[#allocation5 + $0x25c] sm:$0xf0]  ;;  %v2918_v42 = vld [vmem:[#allocation5 + $0x3c8] sm:$0xf]  ;;  %v3602_v50 = vld [vmem:[#allocation5 + $0xac] sm:$0xf0] }
  0x5a   :  { %1934 = vmatpush.bf16.msra.mxu0 %v2939_v54  ;;  %v3820_v54 = vld [vmem:[#allocation5 + $0x784] sm:$0xf]  ;;  %v3752_v45 = vld [vmem:[#allocation5 + $0x55c] sm:$0xf0]  ;;  %v2702_v51 = vld [vmem:[#allocation5 + $0x218] sm:$0xf] }
  0x5b   :  { %1948 = vmatpush.bf16.msra.mxu1 %v3131_v55  ;;  %v3392_v55 = vld [vmem:[#allocation5 + $0x798] sm:$0xf0]  ;;  %v3650_v53 = vld [vmem:[#allocation5 + $0x22c] sm:$0xf0]  ;;  %v2486_v62 = vld [vmem:[#allocation5 + $0x68] sm:$0xf] }
  0x5c   :  { %1962 = vmatpush.bf16.msra.mxu2 %v3323_v56  ;;  %v2606_v56 = vld [vmem:[#allocation5 + $0x158] sm:$0xf]  ;;  %v3596_v63 = vld [vmem:[#allocation5 + $0x7c] sm:$0xf0]  ;;  %v3638_v15 = vld [vmem:[#allocation5 + $0x1cc] sm:$0xf0] }
  0x5d   :  { %1976 = vmatpush.bf16.msra.mxu3 %v3515_v61  ;;  %v3674_v61 = vld [vmem:[#allocation5 + $0x2ec] sm:$0xf0]  ;;  %v2462_v11 = vld [vmem:[#allocation5 + $0x38] sm:$0xf]  ;;  %v2630_v27 = vld [vmem:[#allocation5 + $0x188] sm:$0xf] }
  0x5e   :  { %1935 = vmatpush.bf16.msra.mxu0 %v2915_v3  ;;  %v3770_v3 = vld [vmem:[#allocation5 + $0x5ec] sm:$0xf0]  ;;  %v2799_v7 = vor.u32 %v3674_v61, %v2798_v59  ;;  %v2511_v59 = vor.u32 %v3602_v50, %v2510_v49  ;;  %v2654_v13 = vld [vmem:[#allocation5 + $0x1b8] sm:$0xf]  ;;  %v3632_v28 = vld [vmem:[#allocation5 + $0x19c] sm:$0xf0] }
  0x5f   :  { %1949 = vmatpush.bf16.msra.mxu1 %v3107_v4  ;;  %v3395_v4 = vor.u32 %v3820_v54, %v3392_v55  ;;  %v3183_v12 = vor.u32 %v3770_v3, %v3182_v2  ;;  %v2894_v54 = vld [vmem:[#allocation5 + $0x398] sm:$0xf]  ;;  %v3698_v55 = vld [vmem:[#allocation5 + $0x3ac] sm:$0xf0]  ;;  %v3644_v2 = vld [vmem:[#allocation5 + $0x1fc] sm:$0xf0]  ;;  %v2655_v25 = vor.u32 %v3638_v15, %v2654_v13 }
  0x60   :  { %1963 = vmatpush.bf16.msra.mxu2 %v3299_v5  ;;  %v2607_v5 = vor.u32 %v3626_v58, %v2606_v56  ;;  %v3086_v56 = vld [vmem:[#allocation5 + $0x518] sm:$0xf]  ;;  %v3746_v58 = vld [vmem:[#allocation5 + $0x52c] sm:$0xf0]  ;;  %v2895_v61 = vor.u32 %v3698_v55, %v2894_v54  ;;  %v2870_v3 = vld [vmem:[#allocation5 + $0x368] sm:$0xf] }
  0x61   :  { %1977 = vmatpush.bf16.msra.mxu3 %v3491_v10  ;;  %v3620_v10 = vld [vmem:[#allocation5 + $0x13c] sm:$0xf0]  ;;  %v2822_v29 = vld [vmem:[#allocation5 + $0x308] sm:$0xf] }
  0x62   :  { %1936 = vmatpush.bf16.msra.mxu0 %v2891_v16  ;;  %v3158_v16 = vld [vmem:[#allocation5 + $0x5a8] sm:$0xf]  ;;  %v3860_v55 = vld [vmem:[#allocation5 + $0x8bc] sm:$0xf0] }
  0x63   :  { %1950 = vmatpush.bf16.msra.mxu1 %v3083_v17  ;;  %v3764_v17 = vld [vmem:[#allocation5 + $0x5bc] sm:$0xf0]  ;;  %v3302_v13 = vld [vmem:[#allocation5 + $0x6c8] sm:$0xf] }
  0x64   :  { %1964 = vmatpush.bf16.msra.mxu2 %v3275_v18  ;;  %v2583_v18 = vor.u32 %v3620_v10, %v2582_v9  ;;  %v3159_v26 = vor.u32 %v3764_v17, %v3158_v16  ;;  %v2846_v16 = vld [vmem:[#allocation5 + $0x338] sm:$0xf]  ;;  %v3686_v17 = vld [vmem:[#allocation5 + $0x34c] sm:$0xf0]  ;;  %v3494_v15 = vld [vmem:[#allocation5 + $0x848] sm:$0xf] }
  0x65   :  { %1978 = vmatpush.bf16.msra.mxu3 %v3467_v24  ;;  %v3614_v24 = vld [vmem:[#allocation5 + $0x10c] sm:$0xf0] }
  0x66   :  { %1937 = vmatpush.bf16.msra.mxu0 %v2867_v30  ;;  %v3134_v30 = vld [vmem:[#allocation5 + $0x578] sm:$0xf] }
  0x67   :  { %1951 = vmatpush.bf16.msra.mxu1 %v3059_v31  ;;  %v3758_v31 = vld [vmem:[#allocation5 + $0x58c] sm:$0xf0] }
  0x68   :  { %1965 = vmatpush.bf16.msra.mxu2 %v3251_v32  ;;  %v2559_v32 = vor.u32 %v3614_v24, %v2558_v21  ;;  %v3135_v40 = vor.u32 %v3758_v31, %v3134_v30  ;;  %v2438_v21 = vld [vmem:[#allocation5 + $0x8] sm:$0xf]  ;;  %v3584_v24 = vld [vmem:[#allocation5 + $0x1c] sm:$0xf0] }
  0x69   :  { %1979 = vmatpush.bf16.msra.mxu3 %v3443_v37  ;;  %v3608_v37 = vld [vmem:[#allocation5 + $0xdc] sm:$0xf0] }
  0x6a   :  { %1938 = vmatpush.bf16.msra.mxu0 %v2843_v44  ;;  %v3110_v44 = vld [vmem:[#allocation5 + $0x548] sm:$0xf]  ;;  %v2535_v46 = vor.u32 %v3608_v37, %v2534_v36  ;;  %v3680_v31 = vld [vmem:[#allocation5 + $0x31c] sm:$0xf0]  ;;  %v3818_v36 = vld [vmem:[#allocation5 + $0x76c] sm:$0xf0] }
  0x6b   :  { %1952 = vmatpush.bf16.msra.mxu1 %v3035_v47  ;;  %v2727_v47 = vor.u32 %v3656_v41, %v2726_v38  ;;  %v3566_v37 = vld [vmem:[#allocation5 + $0x8d8] sm:$0xf]  ;;  %v2439_v38 = vor.u32 %v3584_v24, %v2438_v21  ;;  %v3623_v41 = vld [vmem:[#allocation5 + $0x15c] sm:$0xf]  ;;  %v2728_v21 = vld [vmem:[#allocation5 + $0x260] sm:$0xf0] }
  0x6c   :  { %1966 = vmatpush.bf16.msra.mxu2 %v3227_v48  ;;  %v2919_v48 = vor.u32 %v3704_v43, %v2918_v42  ;;  %v2608_v42 = vld [vmem:[#allocation5 + $0x170] sm:$0xf0]  ;;  %v2631_v43 = vor.u32 %v3632_v28, %v2630_v27  ;;  %v3278_v27 = vld [vmem:[#allocation5 + $0x698] sm:$0xf]  ;;  %v3794_v28 = vld [vmem:[#allocation5 + $0x6ac] sm:$0xf0] }
  0x6d   :  { %1980 = vmatpush.bf16.msra.mxu3 %v3419_v52  ;;  %v3111_v52 = vor.u32 %v3752_v45, %v3110_v44  ;;  %v2823_v44 = vor.u32 %v3680_v31, %v2822_v29  ;;  %v3671_v45 = vld [vmem:[#allocation5 + $0x2dc] sm:$0xf]  ;;  %v2611_v50 = vor.u32 %v3623_v41, %v2608_v42  ;;  %v3470_v29 = vld [vmem:[#allocation5 + $0x818] sm:$0xf]  ;;  %v3842_v31 = vld [vmem:[#allocation5 + $0x82c] sm:$0xf0] }
  0x6e   :  { %1939 = vmatpush.bf16.msra.mxu0 %v2819_v60  ;;  %v2703_v60 = vor.u32 %v3650_v53, %v2702_v51  ;;  %v3350_v51 = vld [vmem:[#allocation5 + $0x728] sm:$0xf]  ;;  %v3788_v42 = vld [vmem:[#allocation5 + $0x67c] sm:$0xf0] }
  0x6f   :  { %1953 = vmatpush.bf16.msra.mxu1 %v3011_v0  ;;  %v2678_v0 = vld [vmem:[#allocation5 + $0x1e8] sm:$0xf] }
  0x70   :  { %1967 = vmatpush.bf16.msra.mxu2 %v3203_v1  ;;  %v3087_v1 = vor.u32 %v3746_v58, %v3086_v56  ;;  %v2679_v9 = vor.u32 %v3644_v2, %v2678_v0  ;;  %v3542_v53 = vld [vmem:[#allocation5 + $0x8a8] sm:$0xf]  ;;  %v3617_v56 = vld [vmem:[#allocation5 + $0x12c] sm:$0xf]  ;;  %v2584_v58 = vld [vmem:[#allocation5 + $0x140] sm:$0xf0] }
  0x71   :  { %1981 = vmatpush.bf16.msra.mxu3 %v3395_v4  ;;  %1940 = vmatmul.bf16.vlgmr.msra.gmra.mxu0 %v4029_v22  ;;  %v3692_v4 = vld [vmem:[#allocation5 + $0x37c] sm:$0xf0]  ;;  %v3326_v0 = vld [vmem:[#allocation5 + $0x6f8] sm:$0xf]  ;;  %v3254_v41 = vld [vmem:[#allocation5 + $0x668] sm:$0xf] }
  0x72   :  { %1988 = vmatpush.bf16.msrb.mxu0 %v2607_v5  ;;  %1954 = vmatmul.bf16.vlgmr.msra.gmra.mxu1 %v4031_v23  ;;  %v3062_v5 = vld [vmem:[#allocation5 + $0x4e8] sm:$0xf]  ;;  %v2871_v10 = vor.u32 %v3692_v4, %v2870_v3  ;;  %v3518_v2 = vld [vmem:[#allocation5 + $0x878] sm:$0xf]  ;;  %v3854_v4 = vld [vmem:[#allocation5 + $0x88c] sm:$0xf0] }
  0x73   :  { %2002 = vmatpush.bf16.msrb.mxu1 %v2799_v7  ;;  %1968 = vmatmul.bf16.vlgmr.msra.gmra.mxu2 %v4035_v35  ;;  %v3740_v7 = vld [vmem:[#allocation5 + $0x4fc] sm:$0xf0] }
  0x74   :  { %2016 = vmatpush.bf16.msrb.mxu2 %v2991_v8  ;;  %1982 = vmatmul.bf16.vlgmr.msra.gmra.mxu3 %v4037_v39  ;;  %v2487_v8 = vor.u32 %v3596_v63, %v2486_v62  ;;  %v3063_v14 = vor.u32 %v3740_v7, %v3062_v5  ;;  %v3543_v62 = vor.u32 %v3860_v55, %v3542_v53  ;;  %v3611_v5 = vld [vmem:[#allocation5 + $0xfc] sm:$0xf]  ;;  %v2560_v7 = vld [vmem:[#allocation5 + $0x110] sm:$0xf0]  ;;  %v3230_v53 = vld [vmem:[#allocation5 + $0x638] sm:$0xf] }
  0x75   :  { %2030 = vmatpush.bf16.msrb.mxu3 %v3183_v12  ;;  %v3590_v12 = vld [vmem:[#allocation5 + $0x4c] sm:$0xf0]  ;;  %v2587_v63 = vor.u32 %v3617_v56, %v2584_v58  ;;  %v3422_v55 = vld [vmem:[#allocation5 + $0x7b8] sm:$0xf] }
  0x76   :  { %1989 = vmatpush.bf16.msrb.mxu0 %v2583_v18  ;;  %v3038_v18 = vld [vmem:[#allocation5 + $0x4b8] sm:$0xf]  ;;  %v3830_v58 = vld [vmem:[#allocation5 + $0x7cc] sm:$0xf0] }
  0x77   :  { %2003 = vmatpush.bf16.msrb.mxu1 %v2775_v19  ;;  %v3734_v19 = vld [vmem:[#allocation5 + $0x4cc] sm:$0xf0] }
  0x78   :  { %2017 = vmatpush.bf16.msrb.mxu2 %v2967_v20  ;;  %v2463_v20 = vor.u32 %v3590_v12, %v2462_v11  ;;  %v3039_v30 = vor.u32 %v3734_v19, %v3038_v18  ;;  %v3519_v11 = vor.u32 %v3854_v4, %v3518_v2  ;;  %v2563_v12 = vor.u32 %v3611_v5, %v2560_v7  ;;  %v3605_v18 = vld [vmem:[#allocation5 + $0xcc] sm:$0xf]  ;;  %v2536_v19 = vld [vmem:[#allocation5 + $0xe0] sm:$0xf0]  ;;  %v3398_v4 = vld [vmem:[#allocation5 + $0x788] sm:$0xf] }
  0x79   :  { %2031 = vmatpush.bf16.msrb.mxu3 %v3159_v26  ;;  %v2847_v26 = vor.u32 %v3686_v17, %v2846_v16  ;;  %v3848_v17 = vld [vmem:[#allocation5 + $0x85c] sm:$0xf0]  ;;  %v3423_v2 = vor.u32 %v3830_v58, %v3422_v55  ;;  %v3581_v7 = vld [vmem:[#allocation5 + $0xc] sm:$0xf] }
  0x7a   :  { %1990 = vmatpush.bf16.msrb.mxu0 %v2559_v32  ;;  %v3014_v32 = vld [vmem:[#allocation5 + $0x488] sm:$0xf]  ;;  %v3824_v5 = vld [vmem:[#allocation5 + $0x79c] sm:$0xf0]  ;;  %v3701_v58 = vld [vmem:[#allocation5 + $0x3cc] sm:$0xf] }
  0x7b   :  { %2004 = vmatpush.bf16.msrb.mxu1 %v2751_v33  ;;  %v3728_v33 = vld [vmem:[#allocation5 + $0x49c] sm:$0xf0] }
  0x7c   :  { %2018 = vmatpush.bf16.msrb.mxu2 %v2943_v34  ;;  %v3374_v34 = vld [vmem:[#allocation5 + $0x758] sm:$0xf] }
  0x7d   :  { %2032 = vmatpush.bf16.msrb.mxu3 %v3135_v40  ;;  %v3866_v40 = vld [vmem:[#allocation5 + $0x8ec] sm:$0xf0] }
  0x7e   :  { %1991 = vmatpush.bf16.msrb.mxu0 %v2535_v46  ;;  %v2800_v46 = vld [vmem:[#allocation5 + $0x2f0] sm:$0xf0]  ;;  %v3567_v49 = vor.u32 %v3866_v40, %v3566_v37  ;;  %v3279_v37 = vor.u32 %v3794_v28, %v3278_v27 }
  0x7f   :  { %2005 = vmatpush.bf16.msrb.mxu1 %v2727_v47  ;;  %v3015_v47 = vor.u32 %v3728_v33, %v3014_v32  ;;  %v2803_v54 = vor.u32 %v3671_v45, %v2800_v46  ;;  %v3599_v32 = vld [vmem:[#allocation5 + $0x9c] sm:$0xf]  ;;  %v2512_v33 = vld [vmem:[#allocation5 + $0xb0] sm:$0xf0]  ;;  %v3836_v45 = vld [vmem:[#allocation5 + $0x7fc] sm:$0xf0] }
  0x80   :  { %2019 = vmatpush.bf16.msrb.mxu2 %v2919_v48  ;;  %v3375_v48 = vor.u32 %v3818_v36, %v3374_v34  ;;  %v3647_v34 = vld [vmem:[#allocation5 + $0x21c] sm:$0xf]  ;;  %v2704_v36 = vld [vmem:[#allocation5 + $0x230] sm:$0xf0]  ;;  %v2515_v40 = vor.u32 %v3599_v32, %v2512_v33  ;;  %v3593_v46 = vld [vmem:[#allocation5 + $0x6c] sm:$0xf] }
  0x81   :  { %2033 = vmatpush.bf16.msrb.mxu3 %v3111_v52  ;;  %v3812_v52 = vld [vmem:[#allocation5 + $0x73c] sm:$0xf0]  ;;  %v3160_v33 = vld [vmem:[#allocation5 + $0x5c0] sm:$0xf0] }
  0x82   :  { %1992 = vmatpush.bf16.msrb.mxu0 %v2511_v59  ;;  %v3665_v59 = vld [vmem:[#allocation5 + $0x2ac] sm:$0xf] }
  0x83   :  { %2006 = vmatpush.bf16.msrb.mxu1 %v2703_v60  ;;  %v2776_v60 = vld [vmem:[#allocation5 + $0x2c0] sm:$0xf0] }
  0x84   :  { %2020 = vmatpush.bf16.msrb.mxu2 %v2895_v61  ;;  %v3351_v61 = vor.u32 %v3812_v52, %v3350_v51  ;;  %v2779_v3 = vor.u32 %v3665_v59, %v2776_v60  ;;  %v3587_v59 = vld [vmem:[#allocation5 + $0x3c] sm:$0xf]  ;;  %v2464_v60 = vld [vmem:[#allocation5 + $0x50] sm:$0xf0] }
  0x85   :  { %2034 = vmatpush.bf16.msrb.mxu3 %v3087_v1  ;;  %v3806_v1 = vld [vmem:[#allocation5 + $0x70c] sm:$0xf0] }
  0x86   :  { %1993 = vmatpush.bf16.msrb.mxu0 %v2487_v8  ;;  %v3659_v8 = vld [vmem:[#allocation5 + $0x27c] sm:$0xf] }
  0x87   :  { %2007 = vmatpush.bf16.msrb.mxu1 %v2679_v9  ;;  %v2752_v9 = vld [vmem:[#allocation5 + $0x290] sm:$0xf0] }
  0x88   :  { %2021 = vmatpush.bf16.msrb.mxu2 %v2871_v10  ;;  %v3327_v10 = vor.u32 %v3806_v1, %v3326_v0  ;;  %v2755_v16 = vor.u32 %v3659_v8, %v2752_v9  ;;  %v3206_v0 = vld [vmem:[#allocation5 + $0x608] sm:$0xf]  ;;  %v3776_v1 = vld [vmem:[#allocation5 + $0x61c] sm:$0xf0]  ;;  %v2440_v9 = vld [vmem:[#allocation5 + $0x20] sm:$0xf0] }
  0x89   :  { %2035 = vmatpush.bf16.msrb.mxu3 %v3063_v14  ;;  %v3800_v14 = vld [vmem:[#allocation5 + $0x6dc] sm:$0xf0] }
  0x8a   :  { %1994 = vmatpush.bf16.msrb.mxu0 %v2463_v20  ;;  %v3653_v20 = vld [vmem:[#allocation5 + $0x24c] sm:$0xf]  ;;  %v3303_v24 = vor.u32 %v3800_v14, %v3302_v13  ;;  %v2992_v13 = vld [vmem:[#allocation5 + $0x470] sm:$0xf0]  ;;  %v3767_v14 = vld [vmem:[#allocation5 + $0x5dc] sm:$0xf] }
  0x8b   :  { %2008 = vmatpush.bf16.msrb.mxu1 %v2655_v25  ;;  %v3495_v25 = vor.u32 %v3848_v17, %v3494_v15  ;;  %v3207_v15 = vor.u32 %v3776_v1, %v3206_v0  ;;  %v3815_v17 = vld [vmem:[#allocation5 + $0x75c] sm:$0xf]  ;;  %v3304_v0 = vld [vmem:[#allocation5 + $0x6e0] sm:$0xf0]  ;;  %v3845_v1 = vld [vmem:[#allocation5 + $0x84c] sm:$0xf] }
  0x8c   :  { %2022 = vmatpush.bf16.msrb.mxu2 %v2847_v26  ;;  %v2539_v26 = vor.u32 %v3605_v18, %v2536_v19  ;;  %v3376_v18 = vld [vmem:[#allocation5 + $0x770] sm:$0xf0]  ;;  %v3399_v19 = vor.u32 %v3824_v5, %v3398_v4 }
  0x8d   :  { %2036 = vmatpush.bf16.msrb.mxu3 %v3039_v30  ;;  %v2731_v30 = vor.u32 %v3653_v20, %v2728_v21  ;;  %v2443_v20 = vor.u32 %v3581_v7, %v2440_v9  ;;  %v3863_v21 = vld [vmem:[#allocation5 + $0x8dc] sm:$0xf]  ;;  %v3379_v28 = vor.u32 %v3815_v17, %v3376_v18  ;;  %v3472_v17 = vld [vmem:[#allocation5 + $0x830] sm:$0xf0] }
  0x8e   :  { %1995 = vmatpush.bf16.msrb.mxu0 %v2439_v38  ;;  %v3471_v38 = vor.u32 %v3842_v31, %v3470_v29  ;;  %v3713_v29 = vld [vmem:[#allocation5 + $0x42c] sm:$0xf]  ;;  %v3695_v9 = vld [vmem:[#allocation5 + $0x39c] sm:$0xf] }
  0x8f   :  { %2009 = vmatpush.bf16.msrb.mxu1 %v2631_v43  ;;  %v3446_v43 = vld [vmem:[#allocation5 + $0x7e8] sm:$0xf]  ;;  %v3761_v31 = vld [vmem:[#allocation5 + $0x5ac] sm:$0xf] }
  0x90   :  { %2023 = vmatpush.bf16.msrb.mxu2 %v2823_v44  ;;  %v2707_v44 = vor.u32 %v3647_v34, %v2704_v36  ;;  %v3447_v51 = vor.u32 %v3836_v45, %v3446_v43  ;;  %v3809_v34 = vld [vmem:[#allocation5 + $0x72c] sm:$0xf]  ;;  %v3352_v36 = vld [vmem:[#allocation5 + $0x740] sm:$0xf0]  ;;  %v3755_v45 = vld [vmem:[#allocation5 + $0x57c] sm:$0xf] }
  0x91   :  { %2037 = vmatpush.bf16.msrb.mxu3 %v3015_v47  ;;  %1996 = vmatmul.bf16.vlgmr.msrb.gmra.mxu0 %v4023_v57  ;;  %v2488_v47 = vld [vmem:[#allocation5 + $0x80] sm:$0xf0]  ;;  %v3355_v43 = vor.u32 %v3809_v34, %v3352_v36 }
  0x92   :  { %2044 = vmatpush.bf16.msra.mxu0 %v3375_v48  ;;  %2010 = vmatmul.bf16.vlgmr.msrb.gmra.mxu1 %v4026_v6  ;;  %v3641_v48 = vld [vmem:[#allocation5 + $0x1ec] sm:$0xf]  ;;  %v2491_v52 = vor.u32 %v3593_v46, %v2488_v47  ;;  %v4051_v46 = vld [vmem:[#allocation7] sm:$0x3f] }
  0x93   :  { %2058 = vmatpush.bf16.msra.mxu1 %v3567_v49  ;;  %2024 = vmatmul.bf16.vlgmr.msrb.gmra.mxu2 %v4029_v22  ;;  %v2680_v49 = vld [vmem:[#allocation5 + $0x200] sm:$0xf0] }
  0x94   :  { %2072 = vmatpush.bf16.msra.mxu2 %v2611_v50  ;;  %2038 = vmatmul.bf16.vlgmr.msrb.gmra.mxu3 %v4031_v23  ;;  %v3255_v50 = vor.u32 %v3788_v42, %v3254_v41  ;;  %v2683_v56 = vor.u32 %v3641_v48, %v2680_v49  ;;  %v3707_v41 = vld [vmem:[#allocation5 + $0x3fc] sm:$0xf]  ;;  %v3163_v42 = vor.u32 %v3761_v31, %v3160_v33  ;;  %v3136_v48 = vld [vmem:[#allocation5 + $0x590] sm:$0xf0]  ;;  %v3256_v31 = vld [vmem:[#allocation5 + $0x680] sm:$0xf0] }
  0x95   :  { %2086 = vmatpush.bf16.msra.mxu3 %v2803_v54  ;;  %v3782_v54 = vld [vmem:[#allocation5 + $0x64c] sm:$0xf0]  ;;  %v3803_v49 = vld [vmem:[#allocation5 + $0x6fc] sm:$0xf]  ;;  %v3139_v55 = vor.u32 %v3755_v45, %v3136_v48  ;;  %v3448_v33 = vld [vmem:[#allocation5 + $0x800] sm:$0xf0] }
  0x96   :  { %2045 = vmatpush.bf16.msra.mxu0 %v3351_v61  ;;  %v3635_v61 = vld [vmem:[#allocation5 + $0x1bc] sm:$0xf]  ;;  %v3040_v45 = vld [vmem:[#allocation5 + $0x4d0] sm:$0xf0] }
  0x97   :  { %2059 = vmatpush.bf16.msra.mxu1 %v3543_v62  ;;  %v2656_v62 = vld [vmem:[#allocation5 + $0x1d0] sm:$0xf0] }
  0x98   :  { %2073 = vmatpush.bf16.msra.mxu2 %v2587_v63  ;;  %v3231_v63 = vor.u32 %v3782_v54, %v3230_v53  ;;  %v2659_v8 = vor.u32 %v3635_v61, %v2656_v62  ;;  %v368_v54 = vperm.slane %v4051_v46, 0  ;;  %v3112_v62 = vld [vmem:[#allocation5 + $0x560] sm:$0xf0]  ;;  %v3232_v48 = vld [vmem:[#allocation5 + $0x650] sm:$0xf0] }
  0x99   :  { %2087 = vmatpush.bf16.msra.mxu3 %v2779_v3  ;;  %v2467_v3 = vor.u32 %v3587_v59, %v2464_v60  ;;  %v2920_v59 = vld [vmem:[#allocation5 + $0x3e0] sm:$0xf0]  ;;  %v3749_v60 = vld [vmem:[#allocation5 + $0x54c] sm:$0xf] }
  0x9a   :  { %2046 = vmatpush.bf16.msra.mxu0 %v3327_v10  ;;  %v3629_v10 = vld [vmem:[#allocation5 + $0x18c] sm:$0xf]  ;;  %v2923_v4 = vor.u32 %v3701_v58, %v2920_v59  ;;  %v3115_v7 = vor.u32 %v3749_v60, %v3112_v62  ;;  %v3016_v60 = vld [vmem:[#allocation5 + $0x4a0] sm:$0xf0] }
  0x9b   :  { %2060 = vmatpush.bf16.msra.mxu1 %v3519_v11  ;;  %v2632_v11 = vld [vmem:[#allocation5 + $0x1a0] sm:$0xf0]  ;;  %v3725_v59 = vld [vmem:[#allocation5 + $0x48c] sm:$0xf] }
  0x9c   :  { %2074 = vmatpush.bf16.msra.mxu2 %v2563_v12  ;;  %v3719_v12 = vld [vmem:[#allocation5 + $0x45c] sm:$0xf] }
  0x9d   :  { %2088 = vmatpush.bf16.msra.mxu3 %v2755_v16  ;;  %v3184_v16 = vld [vmem:[#allocation5 + $0x5f0] sm:$0xf0] }
  0x9e   :  { %2047 = vmatpush.bf16.msra.mxu0 %v3303_v24  ;;  %v3568_v24 = vld [vmem:[#allocation5 + $0x8f0] sm:$0xf0]  ;;  %v3187_v27 = vor.u32 %v3767_v14, %v3184_v16  ;;  %v3791_v14 = vld [vmem:[#allocation5 + $0x69c] sm:$0xf] }
  0x9f   :  { %2061 = vmatpush.bf16.msra.mxu1 %v3495_v25  ;;  %v2635_v25 = vor.u32 %v3629_v10, %v2632_v11  ;;  %v3571_v32 = vor.u32 %v3863_v21, %v3568_v24  ;;  %v2896_v10 = vld [vmem:[#allocation5 + $0x3b0] sm:$0xf0]  ;;  %v3743_v11 = vld [vmem:[#allocation5 + $0x51c] sm:$0xf] }
  0xa0   :  { %2075 = vmatpush.bf16.msra.mxu2 %v2539_v26  ;;  %v2995_v26 = vor.u32 %v3719_v12, %v2992_v13  ;;  %v3088_v13 = vld [vmem:[#allocation5 + $0x530] sm:$0xf0]  ;;  %v3839_v16 = vld [vmem:[#allocation5 + $0x81c] sm:$0xf] }
  0xa1   :  { %2089 = vmatpush.bf16.msra.mxu3 %v2731_v30  ;;  %v2968_v30 = vld [vmem:[#allocation5 + $0x440] sm:$0xf0]  ;;  %v3091_v21 = vor.u32 %v3743_v11, %v3088_v13  ;;  %v2998_v11 = vld [vmem:[#allocation5 + $0x460] sm:$0xf] }
  0xa2   :  { %2048 = vmatpush.bf16.msra.mxu0 %v3279_v37  ;;  %v3857_v37 = vld [vmem:[#allocation5 + $0x8ac] sm:$0xf] }
  0xa3   :  { %2062 = vmatpush.bf16.msra.mxu1 %v3471_v38  ;;  %v3544_v38 = vld [vmem:[#allocation5 + $0x8c0] sm:$0xf0] }
  0xa4   :  { %2076 = vmatpush.bf16.msra.mxu2 %v2515_v40  ;;  %v2971_v40 = vor.u32 %v3713_v29, %v2968_v30  ;;  %v3547_v47 = vor.u32 %v3857_v37, %v3544_v38  ;;  %v3064_v29 = vld [vmem:[#allocation5 + $0x500] sm:$0xf0]  ;;  %v3785_v30 = vld [vmem:[#allocation5 + $0x66c] sm:$0xf] }
  0xa5   :  { %2090 = vmatpush.bf16.msra.mxu3 %v2707_v44  ;;  %v2944_v44 = vld [vmem:[#allocation5 + $0x410] sm:$0xf0] }
  0xa6   :  { %2049 = vmatpush.bf16.msra.mxu0 %v3255_v50  ;;  %v3328_v50 = vld [vmem:[#allocation5 + $0x710] sm:$0xf0]  ;;  %v2947_v53 = vor.u32 %v3707_v41, %v2944_v44  ;;  %v3683_v41 = vld [vmem:[#allocation5 + $0x33c] sm:$0xf] }
  0xa7   :  { %2063 = vmatpush.bf16.msra.mxu1 %v3447_v51  ;;  %v3851_v51 = vld [vmem:[#allocation5 + $0x87c] sm:$0xf] }
  0xa8   :  { %2077 = vmatpush.bf16.msra.mxu2 %v2491_v52  ;;  %v3520_v52 = vld [vmem:[#allocation5 + $0x890] sm:$0xf0] }
  0xa9   :  { %2091 = vmatpush.bf16.msra.mxu3 %v2683_v56  ;;  %v3331_v56 = vor.u32 %v3803_v49, %v3328_v50  ;;  %v3523_v61 = vor.u32 %v3851_v51, %v3520_v52  ;;  %v3827_v49 = vld [vmem:[#allocation5 + $0x7bc] sm:$0xf]  ;;  %v3424_v50 = vld [vmem:[#allocation5 + $0x7d0] sm:$0xf0] }
  0xaa   :  { %2050 = vmatpush.bf16.msra.mxu0 %v3231_v63  ;;  %v3797_v63 = vld [vmem:[#allocation5 + $0x6cc] sm:$0xf] }
  0xab   :  { %2064 = vmatpush.bf16.msra.mxu1 %v3423_v2  ;;  %v3496_v2 = vld [vmem:[#allocation5 + $0x860] sm:$0xf0] }
  0xac   :  { %2078 = vmatpush.bf16.msra.mxu2 %v2467_v3  ;;  %v3499_v12 = vor.u32 %v3845_v1, %v3496_v2  ;;  %v3821_v1 = vld [vmem:[#allocation5 + $0x78c] sm:$0xf]  ;;  %v3400_v2 = vld [vmem:[#allocation5 + $0x7a0] sm:$0xf0] }
  0xad   :  { %2092 = vmatpush.bf16.msra.mxu3 %v2659_v8  ;;  %v3307_v8 = vor.u32 %v3797_v63, %v3304_v0  ;;  %v3427_v63 = vor.u32 %v3827_v49, %v3424_v50  ;;  %v3208_v0 = vld [vmem:[#allocation5 + $0x620] sm:$0xf0]  ;;  %v3142_v50 = vld [vmem:[#allocation5 + $0x580] sm:$0xf] }
  0xae   :  { %2051 = vmatpush.bf16.msra.mxu0 %v3207_v15  ;;  %v1829_v3 = vpop.f32.mrf.mxu0  ;;  %v3280_v15 = vld [vmem:[#allocation5 + $0x6b0] sm:$0xf0] }
  0xaf   :  { %2065 = vmatpush.bf16.msra.mxu1 %v3399_v19  ;;  %v1830_v5 = vadd.f32 %v1829_v3, %v368_v54  ;;  %v1843_v18 = vpop.f32.mrf.mxu1  ;;  %v2899_v19 = vor.u32 %v3695_v9, %v2896_v10  ;;  %v3283_v24 = vor.u32 %v3791_v14, %v3280_v15  ;;  %v3675_v10 = vld [vmem:[#allocation5 + $0x2f4] sm:$0xf0]  ;;  %v3019_v14 = vor.u32 %v3725_v59, %v3016_v60  ;;  %v3657_v60 = vld [vmem:[#allocation5 + $0x264] sm:$0xf0] }
  0xb0   :  { %2079 = vmatpush.bf16.msra.mxu2 %v2443_v20 }
  0xb1   :  { %2093 = vmatpush.bf16.msra.mxu3 %v2635_v25  ;;  %2052 = vmatmul.bf16.vlgmr.msra.gmra.mxu0 %v4035_v35  ;;  %v1844_v20 = vadd.f32 %v1843_v18, %v1830_v5  ;;  %v3689_v25 = vld [vmem:[#allocation5 + $0x36c] sm:$0xf]  ;;  %v2614_v5 = vld [vmem:[#allocation5 + $0x160] sm:$0xf]  ;;  %v3403_v18 = vor.u32 %v3821_v1, %v3400_v2  ;;  %v3753_v1 = vld [vmem:[#allocation5 + $0x564] sm:$0xf0] }
  0xb2   :  { %2100 = vmatpush.bf16.msrb.mxu0 %v2995_v26  ;;  %2066 = vmatmul.bf16.vlgmr.msra.gmra.mxu1 %v4037_v39  ;;  %v2872_v26 = vld [vmem:[#allocation5 + $0x380] sm:$0xf0] }
  0xb3   :  { %2114 = vmatpush.bf16.msrb.mxu1 %v3187_v27  ;;  %2080 = vmatmul.bf16.vlgmr.msra.gmra.mxu2 %v4023_v57  ;;  %v3737_v27 = vld [vmem:[#allocation5 + $0x4ec] sm:$0xf]  ;;  %v2875_v36 = vor.u32 %v3689_v25, %v2872_v26  ;;  %v3621_v25 = vld [vmem:[#allocation5 + $0x144] sm:$0xf0]  ;;  %v2782_v26 = vld [vmem:[#allocation5 + $0x2b0] sm:$0xf] }
  0xb4   :  { %2128 = vmatpush.bf16.msrb.mxu2 %v3379_v28  ;;  %2094 = vmatmul.bf16.vlgmr.msra.gmra.mxu3 %v4026_v6  ;;  %v3475_v28 = vor.u32 %v3839_v16, %v3472_v17  ;;  %v3067_v38 = vor.u32 %v3737_v27, %v3064_v29  ;;  %v3190_v16 = vld [vmem:[#allocation5 + $0x5e0] sm:$0xf]  ;;  %v3771_v17 = vld [vmem:[#allocation5 + $0x5f4] sm:$0xf0]  ;;  %v2974_v29 = vld [vmem:[#allocation5 + $0x430] sm:$0xf] }
  0xb5   :  { %2142 = vmatpush.bf16.msrb.mxu3 %v3571_v32  ;;  %v3833_v32 = vld [vmem:[#allocation5 + $0x7ec] sm:$0xf]  ;;  %v3191_v27 = vor.u32 %v3771_v17, %v3190_v16  ;;  %v3699_v16 = vld [vmem:[#allocation5 + $0x3b4] sm:$0xf0]  ;;  %v3094_v17 = vld [vmem:[#allocation5 + $0x520] sm:$0xf] }
  0xb6   :  { %2101 = vmatpush.bf16.msrb.mxu0 %v2971_v40  ;;  %v1831_v34 = vpop.f32.mrf.mxu0  ;;  %v3259_v40 = vor.u32 %v3785_v30, %v3256_v31  ;;  %v3451_v44 = vor.u32 %v3833_v32, %v3448_v33  ;;  %v1857_v62 = vpop.f32.mrf.mxu2  ;;  %v3717_v30 = vld [vmem:[#allocation5 + $0x444] sm:$0xf0]  ;;  %v3166_v31 = vld [vmem:[#allocation5 + $0x5b0] sm:$0xf] }
  0xb7   :  { %2115 = vmatpush.bf16.msrb.mxu1 %v3163_v42  ;;  %v1832_v37 = vadd.f32 %v1831_v34, %v368_v54  ;;  %v2848_v42 = vld [vmem:[#allocation5 + $0x350] sm:$0xf0]  ;;  %v1845_v51 = vpop.f32.mrf.mxu1  ;;  %v1858_v3 = vadd.f32 %v1857_v62, %v1844_v20  ;;  %v3765_v32 = vld [vmem:[#allocation5 + $0x5c4] sm:$0xf0] }
  0xb8   :  { %2129 = vmatpush.bf16.msrb.mxu2 %v3355_v43  ;;  %v3731_v43 = vld [vmem:[#allocation5 + $0x4bc] sm:$0xf]  ;;  %v2851_v52 = vor.u32 %v3683_v41, %v2848_v42  ;;  %v2566_v41 = vld [vmem:[#allocation5 + $0x100] sm:$0xf]  ;;  %v3615_v42 = vld [vmem:[#allocation5 + $0x114] sm:$0xf0] }
  0xb9   :  { %2143 = vmatpush.bf16.msrb.mxu3 %v3547_v47  ;;  %v3779_v47 = vld [vmem:[#allocation5 + $0x63c] sm:$0xf]  ;;  %v1846_v54 = vadd.f32 %v1845_v51, %v1832_v37  ;;  %v3759_v51 = vld [vmem:[#allocation5 + $0x594] sm:$0xf0]  ;;  %v3705_v62 = vld [vmem:[#allocation5 + $0x3e4] sm:$0xf0] }
  0xba   :  { %2102 = vmatpush.bf16.msrb.mxu0 %v2947_v53  ;;  %v3677_v53 = vld [vmem:[#allocation5 + $0x30c] sm:$0xf]  ;;  %v3235_v58 = vor.u32 %v3779_v47, %v3232_v48  ;;  %v2950_v47 = vld [vmem:[#allocation5 + $0x400] sm:$0xf]  ;;  %v3711_v48 = vld [vmem:[#allocation5 + $0x414] sm:$0xf0]  ;;  %v3143_v59 = vor.u32 %v3759_v51, %v3142_v50 }
  0xbb   :  { %2116 = vmatpush.bf16.msrb.mxu1 %v3139_v55  ;;  %v2824_v55 = vld [vmem:[#allocation5 + $0x320] sm:$0xf0] }
  0xbc   :  { %2130 = vmatpush.bf16.msrb.mxu2 %v3331_v56  ;;  %v3043_v56 = vor.u32 %v3731_v43, %v3040_v45  ;;  %v2827_v9 = vor.u32 %v3677_v53, %v2824_v55  ;;  %v2758_v43 = vld [vmem:[#allocation5 + $0x280] sm:$0xf]  ;;  %v3663_v45 = vld [vmem:[#allocation5 + $0x294] sm:$0xf0]  ;;  %v2951_v55 = vor.u32 %v3711_v48, %v2950_v47 }
  0xbd   :  { %2144 = vmatpush.bf16.msrb.mxu3 %v3523_v61  ;;  %v3773_v61 = vld [vmem:[#allocation5 + $0x60c] sm:$0xf]  ;;  %v2759_v53 = vor.u32 %v3663_v45, %v2758_v43  ;;  %v3591_v45 = vld [vmem:[#allocation5 + $0x54] sm:$0xf0]  ;;  %v2662_v47 = vld [vmem:[#allocation5 + $0x1c0] sm:$0xf] }
  0xbe   :  { %2103 = vmatpush.bf16.msrb.mxu0 %v2923_v4  ;;  %v1871_v4 = vpop.f32.mrf.mxu3  ;;  %v3211_v15 = vor.u32 %v3773_v61, %v3208_v0  ;;  %v1859_v33 = vpop.f32.mrf.mxu2  ;;  %v2926_v61 = vld [vmem:[#allocation5 + $0x3d0] sm:$0xf] }
  0xbf   :  { %2117 = vmatpush.bf16.msrb.mxu1 %v3115_v7  ;;  %v3627_v7 = vld [vmem:[#allocation5 + $0x174] sm:$0xf0]  ;;  %v4058_v13 = vadd.f32 %v1871_v4, %v1858_v3  ;;  %v3118_v0 = vld [vmem:[#allocation5 + $0x550] sm:$0xf] }
  0xc0   :  { %2131 = vmatpush.bf16.msrb.mxu2 %v3307_v8  ;;  %v2806_v8 = vld [vmem:[#allocation5 + $0x2e0] sm:$0xf] }
  0xc1   :  { %2145 = vmatpush.bf16.msrb.mxu3 %v3499_v12  ;;  %v3723_v12 = vld [vmem:[#allocation5 + $0x474] sm:$0xf0]  ;;  %v2807_v20 = vor.u32 %v3675_v10, %v2806_v8  ;;  %v2518_v8 = vld [vmem:[#allocation5 + $0xa0] sm:$0xf] }
  0xc2   :  { %2104 = vmatpush.bf16.msrb.mxu0 %v2899_v19  ;;  %v2615_v19 = vor.u32 %v3627_v7, %v2614_v5  ;;  %v2927_v7 = vor.u32 %v3705_v62, %v2926_v61  ;;  %v2710_v10 = vld [vmem:[#allocation5 + $0x220] sm:$0xf]  ;;  %v2638_v62 = vld [vmem:[#allocation5 + $0x190] sm:$0xf] }
  0xc3   :  { %2118 = vmatpush.bf16.msrb.mxu1 %v3091_v21  ;;  %v2999_v21 = vor.u32 %v3723_v12, %v2998_v11  ;;  %v3119_v11 = vor.u32 %v3753_v1, %v3118_v0  ;;  %v2830_v0 = vld [vmem:[#allocation5 + $0x310] sm:$0xf] }
  0xc4   :  { %2132 = vmatpush.bf16.msrb.mxu2 %v3283_v24  ;;  %v2590_v24 = vld [vmem:[#allocation5 + $0x130] sm:$0xf] }
  0xc5   :  { %2146 = vmatpush.bf16.msrb.mxu3 %v3475_v28  ;;  %v3669_v28 = vld [vmem:[#allocation5 + $0x2c4] sm:$0xf0]  ;;  %v2591_v34 = vor.u32 %v3621_v25, %v2590_v24  ;;  %v2494_v24 = vld [vmem:[#allocation5 + $0x70] sm:$0xf] }
  0xc6   :  { %2105 = vmatpush.bf16.msrb.mxu0 %v2875_v36  ;;  %v1860_v36 = vadd.f32 %v1859_v33, %v1846_v54  ;;  %v1873_v37 = vpop.f32.mrf.mxu3  ;;  %v2542_v54 = vld [vmem:[#allocation5 + $0xd0] sm:$0xf]  ;;  %v3597_v25 = vld [vmem:[#allocation5 + $0x84] sm:$0xf0] }
  0xc7   :  { %2119 = vmatpush.bf16.msrb.mxu1 %v3067_v38  ;;  %v2783_v38 = vor.u32 %v3669_v28, %v2782_v26  ;;  %v2686_v26 = vld [vmem:[#allocation5 + $0x1f0] sm:$0xf]  ;;  %v3645_v28 = vld [vmem:[#allocation5 + $0x204] sm:$0xf0] }
  0xc8   :  { %2133 = vmatpush.bf16.msrb.mxu2 %v3259_v40  ;;  %v2975_v40 = vor.u32 %v3717_v30, %v2974_v29  ;;  %v4061_v49 = vadd.f32 %v1873_v37, %v1860_v36  ;;  %v2878_v29 = vld [vmem:[#allocation5 + $0x370] sm:$0xf]  ;;  %v3693_v30 = vld [vmem:[#allocation5 + $0x384] sm:$0xf0] }
  0xc9   :  { %2147 = vmatpush.bf16.msrb.mxu3 %v3451_v44  ;;  %v3167_v44 = vor.u32 %v3765_v32, %v3166_v31  ;;  %v3070_v33 = vld [vmem:[#allocation5 + $0x4f0] sm:$0xf]  ;;  %v2879_v43 = vor.u32 %v3693_v30, %v2878_v29  ;;  %v3813_v29 = vld [vmem:[#allocation5 + $0x744] sm:$0xf0] }
  0xca   :  { %2106 = vmatpush.bf16.msrb.mxu0 %v2851_v52  ;;  %v2567_v52 = vor.u32 %v3615_v42, %v2566_v41  ;;  %v2687_v42 = vor.u32 %v3645_v28, %v2686_v26  ;;  %v3550_v30 = vld [vmem:[#allocation5 + $0x8b0] sm:$0xf] }
  0xcb   :  { %2120 = vmatpush.bf16.msrb.mxu1 %v3043_v56  ;;  %v3609_v56 = vld [vmem:[#allocation5 + $0xe4] sm:$0xf0] }
  0xcc   :  { %2134 = vmatpush.bf16.msrb.mxu2 %v3235_v58  ;;  %v2734_v58 = vld [vmem:[#allocation5 + $0x250] sm:$0xf]  ;;  %v2543_v3 = vor.u32 %v3609_v56, %v2542_v54  ;;  %v3046_v54 = vld [vmem:[#allocation5 + $0x4c0] sm:$0xf] }
  0xcd   :  { %2148 = vmatpush.bf16.msrb.mxu3 %v3427_v63  ;;  %v2735_v5 = vor.u32 %v3657_v60, %v2734_v58  ;;  %v2446_v58 = vld [vmem:[#allocation5 + $0x10] sm:$0xf] }
  0xce   :  { %2107 = vmatpush.bf16.msrb.mxu0 %v2827_v9  ;;  %v1885_v63 = vpop.f32.mrf.mxu0  ;;  %v3603_v9 = vld [vmem:[#allocation5 + $0xb4] sm:$0xf0] }
  0xcf   :  { %2121 = vmatpush.bf16.msrb.mxu1 %v3019_v14  ;;  %v1886_v2 = vadd.f32 %v1885_v63, %v4058_v13  ;;  %v1899_v4 = vpop.f32.mrf.mxu1  ;;  %v3651_v14 = vld [vmem:[#allocation5 + $0x234] sm:$0xf0]  ;;  %v369_v13 = vperm.slane %v4051_v46, 1  ;;  %v3633_v63 = vld [vmem:[#allocation5 + $0x1a4] sm:$0xf0] }
  0xd0   :  { %2135 = vmatpush.bf16.msrb.mxu2 %v3211_v15  ;;  %v2902_v15 = vld [vmem:[#allocation5 + $0x3a0] sm:$0xf] }
  0xd1   :  { %2149 = vmatpush.bf16.msrb.mxu3 %v3403_v18  ;;  %2108 = vmatmul.bf16.vlgmr.msrb.gmra.mxu0 %v4029_v22  ;;  %v4067_v12 = vadd.f32 %v1899_v4, %v1886_v2  ;;  %v3747_v18 = vld [vmem:[#allocation5 + $0x534] sm:$0xf0]  ;;  %v3681_v2 = vld [vmem:[#allocation5 + $0x324] sm:$0xf0] }
  0xd2   :  { %2156 = vmatpush.bf16.msra.mxu0 %v2615_v19  ;;  %2122 = vmatmul.bf16.vlgmr.msrb.gmra.mxu1 %v4031_v23  ;;  %v2519_v19 = vor.u32 %v3603_v9, %v2518_v8  ;;  %v3729_v4 = vld [vmem:[#allocation5 + $0x4a4] sm:$0xf0]  ;;  %v3819_v8 = vld [vmem:[#allocation5 + $0x774] sm:$0xf0]  ;;  %v3574_v9 = vld [vmem:[#allocation5 + $0x8e0] sm:$0xf] }
  0xd3   :  { %2170 = vmatpush.bf16.msra.mxu1 %v2807_v20  ;;  %2136 = vmatmul.bf16.vlgmr.msrb.gmra.mxu2 %v4035_v35  ;;  %v2711_v20 = vor.u32 %v3651_v14, %v2710_v10  ;;  %v3867_v14 = vld [vmem:[#allocation5 + $0x8f4] sm:$0xf0] }
  0xd4   :  { %2184 = vmatpush.bf16.msra.mxu2 %v2999_v21  ;;  %2150 = vmatmul.bf16.vlgmr.msrb.gmra.mxu3 %v4037_v39  ;;  %v2903_v21 = vor.u32 %v3699_v16, %v2902_v15  ;;  %v3624_v15 = vld [vmem:[#allocation5 + $0x164] sm:$0xf]  ;;  %v2616_v16 = vld [vmem:[#allocation5 + $0x178] sm:$0xf0] }
  0xd5   :  { %2198 = vmatpush.bf16.msra.mxu3 %v3191_v27  ;;  %v3095_v27 = vor.u32 %v3747_v18, %v3094_v17  ;;  %v2639_v18 = vor.u32 %v3633_v63, %v2638_v62  ;;  %v2619_v28 = vor.u32 %v3624_v15, %v2616_v16  ;;  %v3849_v62 = vld [vmem:[#allocation5 + $0x864] sm:$0xf0]  ;;  %v3606_v63 = vld [vmem:[#allocation5 + $0xd4] sm:$0xf] }
  0xd6   :  { %2157 = vmatpush.bf16.msra.mxu0 %v2591_v34  ;;  %v1913_v31 = vpop.f32.mrf.mxu2  ;;  %v1887_v32 = vpop.f32.mrf.mxu0  ;;  %v3741_v34 = vld [vmem:[#allocation5 + $0x504] sm:$0xf0] }
  0xd7   :  { %2171 = vmatpush.bf16.msra.mxu1 %v2783_v38  ;;  %v1914_v36 = vadd.f32 %v1913_v31, %v369_v13  ;;  %v1927_v37 = vpop.f32.mrf.mxu3  ;;  %v1888_v38 = vadd.f32 %v1887_v32, %v4061_v49  ;;  %v1901_v41 = vpop.f32.mrf.mxu1  ;;  %v3071_v50 = vor.u32 %v3741_v34, %v3070_v33  ;;  %v3735_v49 = vld [vmem:[#allocation5 + $0x4d4] sm:$0xf0]  ;;  %v3861_v32 = vld [vmem:[#allocation5 + $0x8c4] sm:$0xf0]  ;;  %v3618_v33 = vld [vmem:[#allocation5 + $0x134] sm:$0xf] }
  0xd8   :  { %2185 = vmatpush.bf16.msra.mxu2 %v2975_v40  ;;  %v2495_v40 = vor.u32 %v3597_v25, %v2494_v24  ;;  %v3047_v1 = vor.u32 %v3735_v49, %v3046_v54  ;;  %v2592_v34 = vld [vmem:[#allocation5 + $0x148] sm:$0xf0] }
  0xd9   :  { %2199 = vmatpush.bf16.msra.mxu3 %v3167_v44  ;;  %v2470_v44 = vld [vmem:[#allocation5 + $0x40] sm:$0xf]  ;;  %v4071_v48 = vadd.f32 %v1927_v37, %v1914_v36  ;;  %v4073_v51 = vadd.f32 %v1901_v41, %v1888_v38  ;;  %v3666_v36 = vld [vmem:[#allocation5 + $0x2b4] sm:$0xf]  ;;  %v2784_v37 = vld [vmem:[#allocation5 + $0x2c8] sm:$0xf0]  ;;  %v2595_v41 = vor.u32 %v3618_v33, %v2592_v34 }
  0xda   :  { %2158 = vmatpush.bf16.msra.mxu0 %v2567_v52  ;;  %v3639_v52 = vld [vmem:[#allocation5 + $0x1d4] sm:$0xf0]  ;;  %v2471_v56 = vor.u32 %v3591_v45, %v2470_v44  ;;  %v3526_v44 = vld [vmem:[#allocation5 + $0x880] sm:$0xf]  ;;  %v2787_v45 = vor.u32 %v3666_v36, %v2784_v37  ;;  %v2496_v33 = vld [vmem:[#allocation5 + $0x88] sm:$0xf0] }
  0xdb   :  { %2172 = vmatpush.bf16.msra.mxu1 %v2759_v53  ;;  %v2854_v53 = vld [vmem:[#allocation5 + $0x340] sm:$0xf]  ;;  %v2663_v60 = vor.u32 %v3639_v52, %v2662_v47  ;;  %v3855_v47 = vld [vmem:[#allocation5 + $0x894] sm:$0xf0]  ;;  %v2568_v52 = vld [vmem:[#allocation5 + $0x118] sm:$0xf0] }
  0xdc   :  { %2186 = vmatpush.bf16.msra.mxu2 %v2951_v55  ;;  %v3687_v55 = vld [vmem:[#allocation5 + $0x354] sm:$0xf0]  ;;  %v3527_v49 = vor.u32 %v3855_v47, %v3526_v44 }
  0xdd   :  { %2200 = vmatpush.bf16.msra.mxu3 %v3143_v59  ;;  %v3585_v59 = vld [vmem:[#allocation5 + $0x24] sm:$0xf0]  ;;  %v2855_v61 = vor.u32 %v3687_v55, %v2854_v53  ;;  %v3660_v53 = vld [vmem:[#allocation5 + $0x284] sm:$0xf]  ;;  %v2760_v55 = vld [vmem:[#allocation5 + $0x298] sm:$0xf0] }
  0xde   :  { %2159 = vmatpush.bf16.msra.mxu0 %v2543_v3  ;;  %v3022_v3 = vld [vmem:[#allocation5 + $0x490] sm:$0xf] }
  0xdf   :  { %2173 = vmatpush.bf16.msra.mxu1 %v2735_v5  ;;  %v1915_v5 = vpop.f32.mrf.mxu2  ;;  %v1929_v17 = vpop.f32.mrf.mxu3  ;;  %v3023_v25 = vor.u32 %v3729_v4, %v3022_v3  ;;  %v2736_v3 = vld [vmem:[#allocation5 + $0x268] sm:$0xf0] }
  0xe0   :  { %2187 = vmatpush.bf16.msra.mxu2 %v2927_v7  ;;  %v3382_v7 = vld [vmem:[#allocation5 + $0x760] sm:$0xf]  ;;  %v1916_v10 = vadd.f32 %v1915_v5, %v369_v13  ;;  %v3358_v13 = vld [vmem:[#allocation5 + $0x730] sm:$0xf] }
  0xe1   :  { %2201 = vmatpush.bf16.msra.mxu3 %v3119_v11  ;;  %v2447_v11 = vor.u32 %v3585_v59, %v2446_v58  ;;  %v3383_v26 = vor.u32 %v3819_v8, %v3382_v7  ;;  %v3359_v38 = vor.u32 %v3813_v29, %v3358_v13  ;;  %v3310_v58 = vld [vmem:[#allocation5 + $0x6d0] sm:$0xf]  ;;  %v3801_v59 = vld [vmem:[#allocation5 + $0x6e4] sm:$0xf0] }
  0xe2   :  { %2160 = vmatpush.bf16.msra.mxu0 %v2519_v19  ;;  %v2831_v19 = vor.u32 %v3681_v2, %v2830_v0  ;;  %v4075_v24 = vadd.f32 %v1929_v17, %v1916_v10  ;;  %v2544_v0 = vld [vmem:[#allocation5 + $0xe8] sm:$0xf0]  ;;  %v3654_v2 = vld [vmem:[#allocation5 + $0x254] sm:$0xf]  ;;  %v3311_v5 = vor.u32 %v3801_v59, %v3310_v58  ;;  %v3286_v10 = vld [vmem:[#allocation5 + $0x6a0] sm:$0xf] }
  0xe3   :  { %2174 = vmatpush.bf16.msra.mxu1 %v2711_v20  ;;  %v3672_v20 = vld [vmem:[#allocation5 + $0x2e4] sm:$0xf]  ;;  %v2739_v15 = vor.u32 %v3654_v2, %v2736_v3  ;;  %v3843_v17 = vld [vmem:[#allocation5 + $0x834] sm:$0xf0]  ;;  %v3454_v13 = vld [vmem:[#allocation5 + $0x7f0] sm:$0xf] }
  0xe4   :  { %2188 = vmatpush.bf16.msra.mxu2 %v2903_v21  ;;  %v2808_v21 = vld [vmem:[#allocation5 + $0x2f8] sm:$0xf0]  ;;  %v3636_v59 = vld [vmem:[#allocation5 + $0x1c4] sm:$0xf]  ;;  %v3825_v2 = vld [vmem:[#allocation5 + $0x7a4] sm:$0xf0] }
  0xe5   :  { %2202 = vmatpush.bf16.msra.mxu3 %v3095_v27  ;;  %v3575_v27 = vor.u32 %v3867_v14, %v3574_v9  ;;  %v2811_v31 = vor.u32 %v3672_v20, %v2808_v21  ;;  %v2547_v9 = vor.u32 %v3606_v63, %v2544_v0  ;;  %v3478_v14 = vld [vmem:[#allocation5 + $0x820] sm:$0xf]  ;;  %v3648_v20 = vld [vmem:[#allocation5 + $0x224] sm:$0xf]  ;;  %v2712_v21 = vld [vmem:[#allocation5 + $0x238] sm:$0xf0] }
  0xe6   :  { %2161 = vmatpush.bf16.msra.mxu0 %v2495_v40  ;;  %v3551_v40 = vor.u32 %v3861_v32, %v3550_v30  ;;  %v2715_v29 = vor.u32 %v3648_v20, %v2712_v21  ;;  %v3594_v32 = vld [vmem:[#allocation5 + $0x74] sm:$0xf]  ;;  %v2472_v58 = vld [vmem:[#allocation5 + $0x58] sm:$0xf0] }
  0xe7   :  { %2175 = vmatpush.bf16.msra.mxu1 %v2687_v42  ;;  %v3334_v42 = vld [vmem:[#allocation5 + $0x700] sm:$0xf]  ;;  %v2499_v47 = vor.u32 %v3594_v32, %v2496_v33  ;;  %v3582_v3 = vld [vmem:[#allocation5 + $0x14] sm:$0xf]  ;;  %v3384_v20 = vld [vmem:[#allocation5 + $0x778] sm:$0xf0] }
  0xe8   :  { %2189 = vmatpush.bf16.msra.mxu2 %v2879_v43  ;;  %v3807_v43 = vld [vmem:[#allocation5 + $0x714] sm:$0xf0]  ;;  %v2976_v32 = vld [vmem:[#allocation5 + $0x448] sm:$0xf0]  ;;  %v3762_v33 = vld [vmem:[#allocation5 + $0x5b4] sm:$0xf] }
  0xe9   :  { %2203 = vmatpush.bf16.msra.mxu3 %v3071_v50  ;;  %v3612_v50 = vld [vmem:[#allocation5 + $0x104] sm:$0xf]  ;;  %v3335_v54 = vor.u32 %v3807_v43, %v3334_v42 }
  0xea   :  { %2162 = vmatpush.bf16.msra.mxu0 %v2471_v56  ;;  %v2571_v56 = vor.u32 %v3612_v50, %v2568_v52  ;;  %v3238_v50 = vld [vmem:[#allocation5 + $0x640] sm:$0xf]  ;;  %v3783_v52 = vld [vmem:[#allocation5 + $0x654] sm:$0xf0] }
  0xeb   :  { %2176 = vmatpush.bf16.msra.mxu1 %v2663_v60  ;;  %v3502_v60 = vld [vmem:[#allocation5 + $0x850] sm:$0xf] }
  0xec   :  { %2190 = vmatpush.bf16.msra.mxu2 %v2855_v61  ;;  %v2763_v61 = vor.u32 %v3660_v53, %v2760_v55  ;;  %v3503_v8 = vor.u32 %v3849_v62, %v3502_v60  ;;  %v3430_v53 = vld [vmem:[#allocation5 + $0x7c0] sm:$0xf]  ;;  %v2664_v60 = vld [vmem:[#allocation5 + $0x1d8] sm:$0xf0]  ;;  %v3777_v62 = vld [vmem:[#allocation5 + $0x624] sm:$0xf0] }
  0xed   :  { %2204 = vmatpush.bf16.msra.mxu3 %v3047_v1 }
  0xee   :  { %2163 = vmatpush.bf16.msra.mxu0 %v2447_v11  ;;  %v1941_v1 = vpop.f32.mrf.mxu0  ;;  %v3795_v11 = vld [vmem:[#allocation5 + $0x6b4] sm:$0xf0] }
  0xef   :  { %2177 = vmatpush.bf16.msra.mxu1 %v2639_v18  ;;  %v1942_v4 = vadd.f32 %v1941_v1, %v4071_v48  ;;  %v1955_v7 = vpop.f32.mrf.mxu1  ;;  %v3600_v18 = vld [vmem:[#allocation5 + $0xa4] sm:$0xf]  ;;  %v3479_v48 = vor.u32 %v3843_v17, %v3478_v14  ;;  %v3406_v1 = vld [vmem:[#allocation5 + $0x790] sm:$0xf] }
  0xf0   :  { %2191 = vmatpush.bf16.msra.mxu2 %v2831_v19  ;;  %v2520_v19 = vld [vmem:[#allocation5 + $0xb8] sm:$0xf0]  ;;  %v3720_v14 = vld [vmem:[#allocation5 + $0x464] sm:$0xf] }
  0xf1   :  { %2205 = vmatpush.bf16.msra.mxu3 %v3023_v25  ;;  %2164 = vmatmul.bf16.vlgmr.msra.gmra.mxu0 %v4023_v57  ;;  %v1956_v16 = vadd.f32 %v1955_v7, %v1942_v4  ;;  %v3287_v25 = vor.u32 %v3795_v11, %v3286_v10  ;;  %v2667_v4 = vor.u32 %v3636_v59, %v2664_v60  ;;  %v2448_v7 = vld [vmem:[#allocation5 + $0x28] sm:$0xf0]  ;;  %v370_v60 = vperm.slane %v4051_v46, 2 }
  0xf2   :  { %2212 = vmatpush.bf16.msrb.mxu0 %v3383_v26  ;;  %2178 = vmatmul.bf16.vlgmr.msra.gmra.mxu1 %v4026_v6  ;;  %v2523_v26 = vor.u32 %v3600_v18, %v2520_v19  ;;  %v3192_v18 = vld [vmem:[#allocation5 + $0x5f8] sm:$0xf0]  ;;  %v3816_v19 = vld [vmem:[#allocation5 + $0x764] sm:$0xf] }
  0xf3   :  { %2226 = vmatpush.bf16.msrb.mxu1 %v3575_v27  ;;  %2192 = vmatmul.bf16.vlgmr.msra.gmra.mxu2 %v4029_v22  ;;  %v3262_v27 = vld [vmem:[#allocation5 + $0x670] sm:$0xf] }
  0xf4   :  { %2240 = vmatpush.bf16.msrb.mxu2 %v2619_v28  ;;  %2206 = vmatmul.bf16.vlgmr.msra.gmra.mxu3 %v4031_v23  ;;  %v3789_v28 = vld [vmem:[#allocation5 + $0x684] sm:$0xf0] }
  0xf5   :  { %2254 = vmatpush.bf16.msrb.mxu3 %v2811_v31  ;;  %v3837_v31 = vld [vmem:[#allocation5 + $0x804] sm:$0xf0]  ;;  %v3263_v42 = vor.u32 %v3789_v28, %v3262_v27  ;;  %v3576_v27 = vld [vmem:[#allocation5 + $0x8f8] sm:$0xf0] }
  0xf6   :  { %2213 = vmatpush.bf16.msrb.mxu0 %v3359_v38  ;;  %v1969_v30 = vpop.f32.mrf.mxu2  ;;  %v1943_v36 = vpop.f32.mrf.mxu0  ;;  %v3642_v38 = vld [vmem:[#allocation5 + $0x1f4] sm:$0xf] }
  0xf7   :  { %2227 = vmatpush.bf16.msrb.mxu1 %v3551_v40  ;;  %v1970_v34 = vadd.f32 %v1969_v30, %v1956_v16  ;;  %v1983_v37 = vpop.f32.mrf.mxu3  ;;  %v2688_v40 = vld [vmem:[#allocation5 + $0x208] sm:$0xf0]  ;;  %v1957_v43 = vpop.f32.mrf.mxu1  ;;  %v3768_v16 = vld [vmem:[#allocation5 + $0x5e4] sm:$0xf]  ;;  %v3387_v30 = vor.u32 %v3816_v19, %v3384_v20  ;;  %v3288_v19 = vld [vmem:[#allocation5 + $0x6b8] sm:$0xf0] }
  0xf8   :  { %2241 = vmatpush.bf16.msrb.mxu2 %v2595_v41  ;;  %v1944_v41 = vadd.f32 %v1943_v36, %v4075_v24  ;;  %v2691_v55 = vor.u32 %v3642_v38, %v2688_v40  ;;  %v3239_v24 = vor.u32 %v3783_v52, %v3238_v50  ;;  %v3168_v36 = vld [vmem:[#allocation5 + $0x5c8] sm:$0xf0]  ;;  %v3858_v40 = vld [vmem:[#allocation5 + $0x8b4] sm:$0xf]  ;;  %v2952_v50 = vld [vmem:[#allocation5 + $0x418] sm:$0xf0] }
  0xf9   :  { %2255 = vmatpush.bf16.msrb.mxu3 %v2787_v45  ;;  %v4083_v44 = vadd.f32 %v1983_v37, %v1970_v34  ;;  %v3455_v45 = vor.u32 %v3837_v31, %v3454_v13  ;;  %v3714_v31 = vld [vmem:[#allocation5 + $0x434] sm:$0xf]  ;;  %v3360_v38 = vld [vmem:[#allocation5 + $0x748] sm:$0xf0]  ;;  %v3756_v52 = vld [vmem:[#allocation5 + $0x584] sm:$0xf] }
  0xfa   :  { %2214 = vmatpush.bf16.msrb.mxu0 %v3335_v54  ;;  %v1958_v54 = vadd.f32 %v1957_v43, %v1944_v41  ;;  %v3810_v37 = vld [vmem:[#allocation5 + $0x734] sm:$0xf]  ;;  %v3552_v41 = vld [vmem:[#allocation5 + $0x8c8] sm:$0xf0]  ;;  %v3171_v43 = vor.u32 %v3762_v33, %v3168_v36 }
  0xfb   :  { %2228 = vmatpush.bf16.msrb.mxu1 %v3527_v49  ;;  %v3831_v49 = vld [vmem:[#allocation5 + $0x7d4] sm:$0xf0]  ;;  %v3786_v33 = vld [vmem:[#allocation5 + $0x674] sm:$0xf] }
  0xfc   :  { %2242 = vmatpush.bf16.msrb.mxu2 %v2571_v56  ;;  %v3588_v56 = vld [vmem:[#allocation5 + $0x44] sm:$0xf]  ;;  %v3431_v63 = vor.u32 %v3831_v49, %v3430_v53  ;;  %v3555_v53 = vor.u32 %v3858_v40, %v3552_v41  ;;  %v3336_v49 = vld [vmem:[#allocation5 + $0x718] sm:$0xf0] }
  0xfd   :  { %2256 = vmatpush.bf16.msrb.mxu3 %v2763_v61  ;;  %v3214_v61 = vld [vmem:[#allocation5 + $0x610] sm:$0xf]  ;;  %v2475_v0 = vor.u32 %v3588_v56, %v2472_v58  ;;  %v3852_v56 = vld [vmem:[#allocation5 + $0x884] sm:$0xf]  ;;  %v3528_v58 = vld [vmem:[#allocation5 + $0x898] sm:$0xf0] }
  0xfe   :  { %2215 = vmatpush.bf16.msrb.mxu0 %v3311_v5  ;;  %v1971_v5 = vpop.f32.mrf.mxu2  ;;  %v3215_v17 = vor.u32 %v3777_v62, %v3214_v61  ;;  %v3702_v62 = vld [vmem:[#allocation5 + $0x3d4] sm:$0xf] }
  0xff   :  { %2229 = vmatpush.bf16.msrb.mxu1 %v3503_v8  ;;  %v3630_v8 = vld [vmem:[#allocation5 + $0x194] sm:$0xf]  ;;  %v1972_v10 = vadd.f32 %v1971_v5, %v1958_v54  ;;  %v1985_v11 = vpop.f32.mrf.mxu3  ;;  %v3804_v54 = vld [vmem:[#allocation5 + $0x704] sm:$0xf]  ;;  %v3504_v5 = vld [vmem:[#allocation5 + $0x868] sm:$0xf0] }
 0x100   :  { %2243 = vmatpush.bf16.msrb.mxu2 %v2547_v9  ;;  %v2640_v9 = vld [vmem:[#allocation5 + $0x1a8] sm:$0xf0]  ;;  %v3339_v61 = vor.u32 %v3804_v54, %v3336_v49 }
 0x101   :  { %2257 = vmatpush.bf16.msrb.mxu3 %v2739_v15  ;;  %v3000_v15 = vld [vmem:[#allocation5 + $0x478] sm:$0xf0]  ;;  %v4085_v21 = vadd.f32 %v1985_v11, %v1972_v10  ;;  %v2643_v28 = vor.u32 %v3630_v8, %v2640_v9  ;;  %v3696_v11 = vld [vmem:[#allocation5 + $0x3a4] sm:$0xf] }
 0x102   :  { %2216 = vmatpush.bf16.msrb.mxu0 %v3287_v25  ;;  %v3407_v25 = vor.u32 %v3825_v2, %v3406_v1  ;;  %v3003_v13 = vor.u32 %v3720_v14, %v3000_v15  ;;  %v3531_v1 = vor.u32 %v3852_v56, %v3528_v58  ;;  %v3120_v2 = vld [vmem:[#allocation5 + $0x568] sm:$0xf0]  ;;  %v2904_v14 = vld [vmem:[#allocation5 + $0x3b8] sm:$0xf0]  ;;  %v3744_v15 = vld [vmem:[#allocation5 + $0x524] sm:$0xf] }
 0x103   :  { %2230 = vmatpush.bf16.msrb.mxu1 %v3479_v48  ;;  %v2451_v48 = vor.u32 %v3582_v3, %v2448_v7  ;;  %v3798_v3 = vld [vmem:[#allocation5 + $0x6d4] sm:$0xf]  ;;  %v3048_v58 = vld [vmem:[#allocation5 + $0x4d8] sm:$0xf0] }
 0x104   :  { %2244 = vmatpush.bf16.msrb.mxu2 %v2523_v26  ;;  %v3864_v26 = vld [vmem:[#allocation5 + $0x8e4] sm:$0xf] }
 0x105   :  { %2258 = vmatpush.bf16.msrb.mxu3 %v2715_v29  ;;  %v3195_v29 = vor.u32 %v3768_v16, %v3192_v18  ;;  %v3579_v34 = vor.u32 %v3864_v26, %v3576_v27  ;;  %v3792_v18 = vld [vmem:[#allocation5 + $0x6a4] sm:$0xf]  ;;  %v2907_v26 = vor.u32 %v3696_v11, %v2904_v14 }
 0x106   :  { %2217 = vmatpush.bf16.msrb.mxu0 %v3263_v42  ;;  %v2979_v42 = vor.u32 %v3714_v31, %v2976_v32  ;;  %v3072_v32 = vld [vmem:[#allocation5 + $0x508] sm:$0xf0] }
 0x107   :  { %2231 = vmatpush.bf16.msrb.mxu1 %v3455_v45  ;;  %v3363_v45 = vor.u32 %v3810_v37, %v3360_v38  ;;  %v3834_v37 = vld [vmem:[#allocation5 + $0x7f4] sm:$0xf]  ;;  %v3456_v38 = vld [vmem:[#allocation5 + $0x808] sm:$0xf0] }
 0x108   :  { %2245 = vmatpush.bf16.msrb.mxu2 %v2499_v47  ;;  %v3708_v47 = vld [vmem:[#allocation5 + $0x404] sm:$0xf]  ;;  %v3459_v56 = vor.u32 %v3834_v37, %v3456_v38 }
 0x109   :  { %2259 = vmatpush.bf16.msrb.mxu3 %v2691_v55  ;;  %v3144_v55 = vld [vmem:[#allocation5 + $0x598] sm:$0xf0]  ;;  %v2955_v59 = vor.u32 %v3708_v47, %v2952_v50 }
 0x10a   :  { %2218 = vmatpush.bf16.msrb.mxu0 %v3239_v24  ;;  %v3147_v24 = vor.u32 %v3756_v52, %v3144_v55  ;;  %v3684_v52 = vld [vmem:[#allocation5 + $0x344] sm:$0xf] }
 0x10b   :  { %2232 = vmatpush.bf16.msrb.mxu1 %v3431_v63  ;;  %v2928_v63 = vld [vmem:[#allocation5 + $0x3e8] sm:$0xf0]  ;;  %v3732_v55 = vld [vmem:[#allocation5 + $0x4c4] sm:$0xf] }
 0x10c   :  { %2246 = vmatpush.bf16.msrb.mxu2 %v2475_v0  ;;  %v3750_v0 = vld [vmem:[#allocation5 + $0x554] sm:$0xf]  ;;  %v2931_v8 = vor.u32 %v3702_v62, %v2928_v63  ;;  %v3828_v62 = vld [vmem:[#allocation5 + $0x7c4] sm:$0xf]  ;;  %v3432_v63 = vld [vmem:[#allocation5 + $0x7d8] sm:$0xf0] }
 0x10d   :  { %2260 = vmatpush.bf16.msrb.mxu3 %v2667_v4  ;;  %v3846_v4 = vld [vmem:[#allocation5 + $0x854] sm:$0xf]  ;;  %v3123_v46 = vor.u32 %v3750_v0, %v3120_v2  ;;  %v3051_v0 = vor.u32 %v3732_v55, %v3048_v58 }
 0x10e   :  { %2219 = vmatpush.bf16.msrb.mxu0 %v3215_v17  ;;  %v1997_v7 = vpop.f32.mrf.mxu0  ;;  %v3507_v16 = vor.u32 %v3846_v4, %v3504_v5  ;;  %v3096_v17 = vld [vmem:[#allocation5 + $0x538] sm:$0xf0]  ;;  %v3678_v2 = vld [vmem:[#allocation5 + $0x314] sm:$0xf]  ;;  %v3435_v4 = vor.u32 %v3828_v62, %v3432_v63  ;;  %v3024_v5 = vld [vmem:[#allocation5 + $0x4a8] sm:$0xf0] }
 0x10f   :  { %2233 = vmatpush.bf16.msrb.mxu1 %v3407_v25  ;;  %v2011_v9 = vpop.f32.mrf.mxu1  ;;  %v3840_v25 = vld [vmem:[#allocation5 + $0x824] sm:$0xf]  ;;  %v3099_v27 = vor.u32 %v3744_v15, %v3096_v17 }
 0x110   :  { %2247 = vmatpush.bf16.msrb.mxu2 %v2451_v48  ;;  %v3480_v48 = vld [vmem:[#allocation5 + $0x838] sm:$0xf0] }
 0x111   :  { %2261 = vmatpush.bf16.msrb.mxu3 %v2643_v28  ;;  %2220 = vmatmul.bf16.vlgmr.msrb.gmra.mxu0 %v4035_v35  ;;  %v3291_v28 = vor.u32 %v3792_v18, %v3288_v19  ;;  %v3483_v31 = vor.u32 %v3840_v25, %v3480_v48 }
 0x112   :  { %2268 = vmatpush.bf16.msra.mxu0 %v3003_v13  ;;  %2234 = vmatmul.bf16.vlgmr.msrb.gmra.mxu1 %v4037_v39  ;;  %v3690_v13 = vld [vmem:[#allocation5 + $0x374] sm:$0xf] }
 0x113   :  { %2282 = vmatpush.bf16.msra.mxu1 %v3195_v29  ;;  %2248 = vmatmul.bf16.vlgmr.msrb.gmra.mxu2 %v4023_v57  ;;  %v3312_v57 = vld [vmem:[#allocation5 + $0x6e8] sm:$0xf0] }
 0x114   :  { %2296 = vmatpush.bf16.msra.mxu2 %v3387_v30  ;;  %2262 = vmatmul.bf16.vlgmr.msrb.gmra.mxu3 %v4026_v6  ;;  %v1998_v6 = vadd.f32 %v1997_v7, %v370_v60  ;;  %v3315_v10 = vor.u32 %v3798_v3, %v3312_v57  ;;  %v2880_v29 = vld [vmem:[#allocation5 + $0x388] sm:$0xf0]  ;;  %v3738_v30 = vld [vmem:[#allocation5 + $0x4f4] sm:$0xf] }
 0x115   :  { %2310 = vmatpush.bf16.msra.mxu3 %v3579_v34  ;;  %v3264_v34 = vld [vmem:[#allocation5 + $0x688] sm:$0xf0]  ;;  %v3075_v47 = vor.u32 %v3738_v30, %v3072_v32  ;;  %v3726_v57 = vld [vmem:[#allocation5 + $0x494] sm:$0xf] }
 0x116   :  { %2269 = vmatpush.bf16.msra.mxu0 %v2979_v42  ;;  %v2012_v20 = vadd.f32 %v2011_v9, %v1998_v6  ;;  %v2025_v36 = vpop.f32.mrf.mxu2  ;;  %v1999_v40 = vpop.f32.mrf.mxu0  ;;  %v3267_v50 = vor.u32 %v3786_v33, %v3264_v34  ;;  %v2832_v3 = vld [vmem:[#allocation5 + $0x328] sm:$0xf0]  ;;  %v3774_v7 = vld [vmem:[#allocation5 + $0x614] sm:$0xf]  ;;  %v3027_v15 = vor.u32 %v3726_v57, %v3024_v5 }
 0x117   :  { %2283 = vmatpush.bf16.msra.mxu1 %v3171_v43  ;;  %v2039_v42 = vpop.f32.mrf.mxu3  ;;  %v2883_v43 = vor.u32 %v3690_v13, %v2880_v29  ;;  %v2013_v54 = vpop.f32.mrf.mxu1  ;;  %v3822_v9 = vld [vmem:[#allocation5 + $0x794] sm:$0xf]  ;;  %v2835_v14 = vor.u32 %v3678_v2, %v2832_v3 }
 0x118   :  { %2297 = vmatpush.bf16.msra.mxu2 %v3363_v45  ;;  %v2026_v41 = vadd.f32 %v2025_v36, %v2012_v20  ;;  %v2000_v45 = vadd.f32 %v1999_v40, %v370_v60 }
 0x119   :  { %2311 = vmatpush.bf16.msra.mxu3 %v3555_v53  ;;  %v2856_v53 = vld [vmem:[#allocation5 + $0x358] sm:$0xf0] }
 0x11a   :  { %2270 = vmatpush.bf16.msra.mxu0 %v2955_v59  ;;  %v4092_v49 = vadd.f32 %v2039_v42, %v2026_v41  ;;  %v3780_v59 = vld [vmem:[#allocation5 + $0x644] sm:$0xf]  ;;  %v2859_v60 = vor.u32 %v3684_v52, %v2856_v53 }
 0x11b   :  { %2284 = vmatpush.bf16.msra.mxu1 %v3147_v24  ;;  %v3240_v24 = vld [vmem:[#allocation5 + $0x658] sm:$0xf0]  ;;  %v3880_v41 = vld [vmem:[#allocation7] sm:$0x3f] }
 0x11c   :  { %2298 = vmatpush.bf16.msra.mxu2 %v3339_v61  ;;  %v2014_v61 = vadd.f32 %v2013_v54, %v2000_v45  ;;  %v371_v42 = vperm.slane %v3880_v41, 3 }
 0x11d   :  { %2312 = vmatpush.bf16.msra.mxu3 %v3531_v1  ;;  %v3243_v1 = vor.u32 %v3780_v59, %v3240_v24 }
 0x11e   :  { %2271 = vmatpush.bf16.msra.mxu0 %v2931_v8  ;;  %v3216_v8 = vld [vmem:[#allocation5 + $0x628] sm:$0xf0]  ;;  %v2027_v6 = vpop.f32.mrf.mxu2 }
 0x11f   :  { %2285 = vmatpush.bf16.msra.mxu1 %v3123_v46  ;;  %v3408_v46 = vld [vmem:[#allocation5 + $0x7a8] sm:$0xf0]  ;;  %v2041_v11 = vpop.f32.mrf.mxu3 }
 0x120   :  { %2299 = vmatpush.bf16.msra.mxu2 %v3315_v10  ;;  %v2028_v10 = vadd.f32 %v2027_v6, %v2014_v61  ;;  %v3411_v18 = vor.u32 %v3822_v9, %v3408_v46 }
 0x121   :  { %2313 = vmatpush.bf16.msra.mxu3 %v3507_v16  ;;  %v3219_v16 = vor.u32 %v3774_v7, %v3216_v8 }
 0x122   :  { %2272 = vmatpush.bf16.msra.mxu0 %v2907_v26  ;;  %v4094_v17 = vadd.f32 %v2041_v11, %v2028_v10  ;;  %v4106_v11 = vmax.f32 %v4083_v44, 0.0 }
 0x123   :  { %2286 = vmatpush.bf16.msra.mxu1 %v3099_v27 }
 0x124   :  { %2300 = vmatpush.bf16.msra.mxu2 %v3291_v28  ;;  %v2337_v44 = vmul.f32 %v4106_v11, %v4106_v11 }
 0x125   :  { %2314 = vmatpush.bf16.msra.mxu3 %v3483_v31 }
 0x126   :  { %2273 = vmatpush.bf16.msra.mxu0 %v2883_v43  ;;  %v372_v43 = vperm.slane %v3880_v41, 4 }
 0x127   :  { %2287 = vmatpush.bf16.msra.mxu1 %v3075_v47 }
 0x128   :  { %2301 = vmatpush.bf16.msra.mxu2 %v3267_v50 }
 0x129   :  { %2315 = vmatpush.bf16.msra.mxu3 %v3459_v56 }
 0x12a   :  { %2274 = vmatpush.bf16.msra.mxu0 %v2859_v60 }
 0x12b   :  { %2288 = vmatpush.bf16.msra.mxu1 %v3051_v0 }
 0x12c   :  { %2302 = vmatpush.bf16.msra.mxu2 %v3243_v1  ;;  %v373_v1 = vperm.slane %v3880_v41, 5 }
 0x12d   :  { %2316 = vmatpush.bf16.msra.mxu3 %v3435_v4 }
 0x12e   :  { %2275 = vmatpush.bf16.msra.mxu0 %v2835_v14  ;;  %v2053_v19 = vpop.f32.mrf.mxu0 }
 0x12f   :  { %2289 = vmatpush.bf16.msra.mxu1 %v3027_v15  ;;  %v2067_v20 = vpop.f32.mrf.mxu1  ;;  %v2054_v2 = vadd.f32 %v2053_v19, %v4092_v49  ;;  %v4109_v49 = vmax.f32 %v4067_v12, 0.0 }
 0x130   :  { %2303 = vmatpush.bf16.msra.mxu2 %v3219_v16 }
 0x131   :  { %2317 = vmatpush.bf16.msra.mxu3 %v3411_v18  ;;  %2276 = vmatmul.bf16.vlgmr.msra.gmra.mxu0 %v4029_v22  ;;  %v2068_v6 = vadd.f32 %v2067_v20, %v2054_v2  ;;  %v2336_v12 = vmul.f32 %v4109_v49, %v4109_v49 }
 0x132   :  { %2290 = vmatmul.bf16.vlgmr.msra.gmra.mxu1 %v4031_v23 }
 0x133   :  { %2304 = vmatmul.bf16.vlgmr.msra.gmra.mxu2 %v4035_v35  ;;  %v4111_v19 = vmax.f32 %v2068_v6, 0.0 }
 0x134   :  { %2318 = vmatmul.bf16.vlgmr.msra.gmra.mxu3 %v4037_v39 }
 0x136   :  { %v2081_v25 = vpop.f32.mrf.mxu2  ;;  %v2055_v26 = vpop.f32.mrf.mxu0 }
 0x137   :  { %v2095_v48 = vpop.f32.mrf.mxu3  ;;  %v4100_v27 = vpop.f32.mrf.mxu1  ;;  %v2082_v47 = vadd.f32 %v2081_v25, %v371_v42 }
 0x139   :  { %v2096_v55 = vadd.f32 %v2095_v48, %v2082_v47  ;;  %v2056_v48 = vadd.f32 %v2055_v26, %v4094_v17 }
 0x13b   :  { %v2070_v17 = vadd.f32 %v4100_v27, %v2056_v48  ;;  %v4132_v27 = vmax.f32 %v4073_v51, 0.0 }
 0x13d   :  { %v2342_v51 = vmul.f32 %v4132_v27, %v4132_v27 }
 0x13e   :  { %v2083_v28 = vpop.f32.mrf.mxu2 }
 0x13f   :  { %v2097_v13 = vpop.f32.mrf.mxu3  ;;  %v2084_v24 = vadd.f32 %v2083_v28, %v371_v42 }
 0x141   :  { %v2098_v3 = vadd.f32 %v2097_v13, %v2084_v24 }
 0x14e   :  { %v2109_v29 = vpop.f32.mrf.mxu0 }
 0x14f   :  { %v2123_v30 = vpop.f32.mrf.mxu1  ;;  %v2110_v58 = vadd.f32 %v2109_v29, %v2096_v55 }
 0x151   :  { %v2124_v60 = vadd.f32 %v2123_v30, %v2110_v58 }
 0x156   :  { %v2137_v31 = vpop.f32.mrf.mxu2  ;;  %v2111_v22 = vpop.f32.mrf.mxu0 }
 0x157   :  { %v2151_v32 = vpop.f32.mrf.mxu3  ;;  %v2125_v33 = vpop.f32.mrf.mxu1  ;;  %v2138_v7 = vadd.f32 %v2137_v31, %v2124_v60  ;;  %v2112_v9 = vadd.f32 %v2111_v22, %v2098_v3 }
 0x159   :  { %v2152_v15 = vadd.f32 %v2151_v32, %v2138_v7  ;;  %v2126_v28 = vadd.f32 %v2125_v33, %v2112_v9 }
 0x15b   :  { %v4116_v31 = vmax.f32 %v2152_v15, 0.0 }
 0x15e   :  { %v2139_v23 = vpop.f32.mrf.mxu2 }
 0x15f   :  { %v4102_v34 = vpop.f32.mrf.mxu3  ;;  %v2140_v32 = vadd.f32 %v2139_v23, %v2126_v28  ;;  %v2339_v23 = vmul.f32 %v4116_v31, %v4116_v31 }
 0x16e   :  { %v2165_v35 = vpop.f32.mrf.mxu0 }
 0x16f   :  { %v2179_v39 = vpop.f32.mrf.mxu1  ;;  %v2166_v52 = vadd.f32 %v2165_v35, %v372_v43  ;;  %v2338_v35 = vmul.f32 %v4111_v19, %v4111_v19 }
 0x171   :  { %v2180_v56 = vadd.f32 %v2179_v39, %v2166_v52 }
 0x176   :  { %v2193_v36 = vpop.f32.mrf.mxu2  ;;  %v2167_v38 = vpop.f32.mrf.mxu0 }
 0x177   :  { %v2207_v37 = vpop.f32.mrf.mxu3  ;;  %v2181_v40 = vpop.f32.mrf.mxu1  ;;  %v2168_v61 = vadd.f32 %v2167_v38, %v372_v43  ;;  %v2194_v62 = vadd.f32 %v2193_v36, %v2180_v56  ;;  %v2348_v36 = vadd.f32 %v2337_v44, %v2336_v12 }
 0x179   :  { %v2182_v57 = vadd.f32 %v2181_v40, %v2168_v61  ;;  %v2208_v4 = vadd.f32 %v2207_v37, %v2194_v62  ;;  %v4126_v37 = vmax.f32 %v4085_v21, 0.0  ;;  %v2154_v40 = vadd.f32 %v4102_v34, %v2140_v32 }
 0x17a   :  { %v2349_v47 = vadd.f32 %v2348_v36, %v2338_v35 }
 0x17b   :  { %v4140_v34 = vmax.f32 %v2154_v40, 0.0 }
 0x17c   :  { %v2350_v58 = vadd.f32 %v2349_v47, %v2339_v23 }
 0x17d   :  { %v2345_v2 = vmul.f32 %v4140_v34, %v4140_v34 }
 0x17e   :  { %v2195_v45 = vpop.f32.mrf.mxu2 }
 0x17f   :  { %v2209_v50 = vpop.f32.mrf.mxu3  ;;  %v2196_v10 = vadd.f32 %v2195_v45, %v2182_v57 }
 0x181   :  { %v2210_v13 = vadd.f32 %v2209_v50, %v2196_v10  ;;  %v4134_v50 = vmax.f32 %v2070_v17, 0.0 }
 0x18e   :  { %v2221_v53 = vpop.f32.mrf.mxu0 }
 0x18f   :  { %v2235_v54 = vpop.f32.mrf.mxu1  ;;  %v2222_v46 = vadd.f32 %v2221_v53, %v2208_v4 }
 0x191   :  { %v2236_v20 = vadd.f32 %v2235_v54, %v2222_v46  ;;  %v2343_v54 = vmul.f32 %v4126_v37, %v4126_v37 }
 0x193   :  { %v4123_v26 = vmax.f32 %v2236_v20, 0.0 }
 0x195   :  { %v2340_v21 = vmul.f32 %v4123_v26, %v4123_v26 }
 0x196   :  { %v2249_v59 = vpop.f32.mrf.mxu2  ;;  %v2223_v0 = vpop.f32.mrf.mxu0 }
 0x197   :  { %v2263_v63 = vpop.f32.mrf.mxu3  ;;  %v2237_v5 = vpop.f32.mrf.mxu1  ;;  %v2250_v8 = vadd.f32 %v2249_v59, %v373_v1  ;;  %v2224_v33 = vadd.f32 %v2223_v0, %v2210_v13  ;;  %v2344_v59 = vmul.f32 %v4134_v50, %v4134_v50  ;;  %v2351_v60 = vadd.f32 %v2350_v58, %v2340_v21 }
 0x199   :  { %v2264_v16 = vadd.f32 %v2263_v63, %v2250_v8  ;;  %v2238_v52 = vadd.f32 %v2237_v5, %v2224_v33 }
 0x19b   :  { %v2334_v61 = vmax.f32 %v2238_v52, 0.0 }
 0x19d   :  { %v2346_v7 = vmul.f32 %v2334_v61, %v2334_v61 }
 0x19e   :  { %v2251_v14 = vpop.f32.mrf.mxu2 }
 0x19f   :  { %v2265_v18 = vpop.f32.mrf.mxu3  ;;  %v2252_v22 = vadd.f32 %v2251_v14, %v373_v1  ;;  %v2355_v1 = vadd.f32 %v2343_v54, %v2342_v51 }
 0x1a1   :  { %v2266_v41 = vadd.f32 %v2265_v18, %v2252_v22  ;;  %v2356_v5 = vadd.f32 %v2355_v1, %v2344_v59 }
 0x1a3   :  { %v2357_v6 = vadd.f32 %v2356_v5, %v2345_v2 }
 0x1a5   :  { %v2358_v10 = vadd.f32 %v2357_v6, %v2346_v7 }
 0x1ae   :  { %v2277_v25 = vpop.f32.mrf.mxu0 }
 0x1af   :  { %v2278_v29 = vadd.f32 %v2277_v25, %v2264_v16  ;;  %v2291_v30 = vpop.f32.mrf.mxu1 }
 0x1b1   :  { %v2292_v39 = vadd.f32 %v2291_v30, %v2278_v29 }
 0x1b6   :  { %v2305_v38 = vpop.f32.mrf.mxu2  ;;  %v2279_v45 = vpop.f32.mrf.mxu0 }
 0x1b7   :  { %v2306_v42 = vadd.f32 %v2305_v38, %v2292_v39  ;;  %v2319_v43 = vpop.f32.mrf.mxu3  ;;  %v2280_v55 = vadd.f32 %v2279_v45, %v2266_v41  ;;  %v2293_v24 = vpop.f32.mrf.mxu1 }
 0x1b9   :  { %v2320_v53 = vadd.f32 %v2319_v43, %v2306_v42  ;;  %v2294_v62 = vadd.f32 %v2293_v24, %v2280_v55 }
 0x1bb   :  { %v2329_v56 = vmax.f32 %v2320_v53, 0.0 }
 0x1bd   :  { %v2341_v63 = vmul.f32 %v2329_v56, %v2329_v56 }
 0x1be   :  { %v2307_v0 = vpop.f32.mrf.mxu2 }
 0x1bf   :  { %v2308_v3 = vadd.f32 %v2307_v0, %v2294_v62  ;;  %v2352_v57 = vadd.f32 %v2351_v60, %v2341_v63  ;;  %v2321_v4 = vpop.f32.mrf.mxu3 }
 0x1c1   :  { %v2322_v8 = vadd.f32 %v2321_v4, %v2308_v3  ;;  %2353 = vadd.xlane.f32.xlu0 %v2352_v57 }
 0x1c3   :  { %v2335_v9 = vmax.f32 %v2322_v8, 0.0 }
 0x1c5   :  { %v2347_v46 = vmul.f32 %v2335_v9, %v2335_v9 }
 0x1c7   :  { %v2359_v14 = vadd.f32 %v2358_v10, %v2347_v46 }
 0x1c9   :  { %2360 = vadd.xlane.f32.xlu0 %v2359_v14 }
 0x234   :  { %v2354_v15 = vpop.xlane.xlu0 %2353 }
 0x235   :  { %v2362_v16 = vmax.f32 %v2354_v15, 1e-24 }
 0x237   :  { %3876 = vrsqrt.f32 %v2362_v16  ;;  %vm2370_vm1 = vweird.f32 %v2362_v16 }
 0x23c   :  { %v2361_v18 = vpop.xlane.xlu0 %2360 }
 0x23d   :  { %v3877_v25 = vpop.eup %3876  ;;  %v2363_v48 = vmax.f32 %v2361_v18, 1e-24 }
 0x23e   :  { %v2365_v28 = vmul.f32 %v3877_v25, %v2362_v16  ;;  %vm2371_vm0 = vweird.f32 %v3877_v25 }
 0x23f   :  { %3878 = vrsqrt.f32 %v2363_v48  ;;  %vm2372_vm2 = vmor %vm2370_vm1, %vm2371_vm0  ;;  %vm2380_vm4 = vweird.f32 %v2363_v48 }
 0x240   :  { %v2366_v20 = vmul.f32 %v3877_v25, %v2365_v28 }
 0x242   :  { %v2367_v13 = vmul.f32 0.5, %v2366_v20 }
 0x244   :  { %v2368_v29 = vsub.f32 1.5, %v2367_v13 }
 0x245   :  { %v3879_v44 = vpop.eup %3878 }
 0x246   :  { %v2369_v30 = vmul.f32 %v3877_v25, %v2368_v29  ;;  %v2375_v32 = vmul.f32 %v3879_v44, %v2363_v48  ;;  %vm2381_vm3 = vweird.f32 %v3879_v44 }
 0x247   :  { %vm2382_vm5 = vmor %vm2380_vm4, %vm2381_vm3 }
 0x248   :  { %v2373_v22 = vsel %vm2372_vm2, %v3877_v25, %v2369_v30  ;;  %v2376_v12 = vmul.f32 %v3879_v44, %v2375_v32 }
 0x249   :  { %v2384_v35 = vmul.f32 %v2373_v22, %v4109_v49  ;;  %v2385_v17 = vmul.f32 %v2373_v22, %v4106_v11  ;;  %v2386_v33 = vmul.f32 %v2373_v22, %v4111_v19  ;;  %v2387_v39 = vmul.f32 %v2373_v22, %v4116_v31 }
 0x24a   :  { %v2377_v36 = vmul.f32 0.5, %v2376_v12  ;;  %v2388_v38 = vmul.f32 %v2373_v22, %v4123_v26  ;;  %v2389_v23 = vmul.f32 %v2373_v22, %v2329_v56 }
 0x24b   :  { %2396 = vst [vmem:[#allocation8] sm:$0xff] %v2384_v35 }
 0x24c   :  { %2397 = vst [vmem:[#allocation8 + $0x8] sm:$0xff] %v2385_v17  ;;  %v2378_v40 = vsub.f32 1.5, %v2377_v36 }
 0x24d   :  { %2398 = vst [vmem:[#allocation8 + $0x10] sm:$0xff] %v2386_v33 }
 0x24e   :  { %2399 = vst [vmem:[#allocation8 + $0x18] sm:$0xff] %v2387_v39  ;;  %v2379_v41 = vmul.f32 %v3879_v44, %v2378_v40 }
 0x24f   :  { %2400 = vst [vmem:[#allocation8 + $0x20] sm:$0xff] %v2388_v38 }
 0x250   :  { %2401 = vst [vmem:[#allocation8 + $0x28] sm:$0xff] %v2389_v23  ;;  %v2383_v11 = vsel %vm2382_vm5, %v3879_v44, %v2379_v41 }
 0x251   :  { %v2390_v49 = vmul.f32 %v2383_v11, %v4132_v27  ;;  %v2391_v19 = vmul.f32 %v2383_v11, %v4126_v37  ;;  %v2392_v31 = vmul.f32 %v2383_v11, %v4134_v50  ;;  %v2393_v26 = vmul.f32 %v2383_v11, %v4140_v34 }
 0x252   :  { %v2394_v42 = vmul.f32 %v2383_v11, %v2334_v61  ;;  %v2395_v43 = vmul.f32 %v2383_v11, %v2335_v9 }
 0x253   :  { %2402 = vst [vmem:[#allocation8 + $0x30] sm:$0xff] %v2390_v49 }
 0x254   :  { %2403 = vst [vmem:[#allocation8 + $0x38] sm:$0xff] %v2391_v19 }
 0x255   :  { %2404 = vst [vmem:[#allocation8 + $0x40] sm:$0xff] %v2392_v31 }
 0x256   :  { %2405 = vst [vmem:[#allocation8 + $0x48] sm:$0xff] %v2393_v26 }
 0x257   :  { %2406 = vst [vmem:[#allocation8 + $0x50] sm:$0xff] %v2394_v42 }
 0x258   :  { %2407 = vst [vmem:[#allocation8 + $0x58] sm:$0xff] %v2395_v43 }
 0x259   :  { %2420 = dma.vmem_to_hbm [thread:$0]  %s2413_s29, 1536, %s2415_s5, [#allocation4], %s3987_s24, %s3987_s24, %s3988_s25  }
 0x25a   :  { %3981 = dma.done.wait [#allocation4], 1536  }
 0x25b   :  { %3982 = vsyncadd [#allocation4], 4294965760 }
 0x25c   :  { %2425 = vsyncpa [#allocation3], 1 }
 0x25d   :  { %2426 = vsyncpa [#allocation6], 1 }
 0x25e   :  { %2427 = vsyncpa [#allocation4], 1 }

</bundles_post_ra>
